<compile_context>
chip_gen: v6e
topology: v6e:2x2x1
jax: 0.10.0
libtpu: 0.0.40
codegen_flags: <defaults>
</compile_context>

<pallas_src>
import math
import functools

import jax
import jax.numpy as jnp
from jax import lax
from jax.experimental import pallas as pl
from jax.experimental.pallas import tpu as pltpu


def _vmem_limit_bytes():
    """Per-generation VMEM budget: leave ~24 MiB headroom, cap at 100 MiB.
    v7x (64 MiB physical) -> 40 MiB; v5e/v6e (128 MiB) -> 100 MiB."""
    phys = 64 * 1024 * 1024
    try:
        phys = int(pltpu.get_tpu_info().vmem_capacity_bytes)
    except Exception:
        pass
    return max(16 * 1024 * 1024, min(phys - 24 * 1024 * 1024, 100 * 1024 * 1024))


def _pick_tile_h(H, W, Ho, Wo, Cin, Cout, k, s, p, itemsize, vmem_budget):
    """Largest divisor of Ho whose lane width (tile_h*Wo) is a multiple of 128 and whose
    per-step footprint fits the VMEM budget; falls back to one whole image per tile."""
    Hp, Wp = H + 2 * p, W + 2 * p

    def footprint(th):
        st = th * Wo
        th_in = (th - 1) * s + k
        b = Cin * Hp * Wp * itemsize              # padded-image scratch
        b += 2 * Cin * H * W * itemsize           # resident input block (double-buffered)
        b += 2 * Cout * Cin * k * k * itemsize    # fused weights
        b += Cin * k * k * st * itemsize          # im2col scratch
        b += 2 * Cout * st * itemsize             # y block (double-buffered)
        b += Cout * st * 4                        # f32 accumulator
        b += Cin * th_in * Wp * itemsize          # row-band temporary
        return b

    cands = [d for d in range(1, Ho + 1)
             if Ho % d == 0 and (d * Wo) % 128 == 0 and d * Wo <= 4096
             and footprint(d) <= 0.75 * vmem_budget]
    if cands:
        return max(cands)
    # TODO(synk): for awkward Wo, add a 128-padded y layout instead of a whole-image tile.
    return Ho


def _pick_lane_tile(S, max_tile=2048):
    """Largest divisor of S that is a multiple of 128 (<= max_tile); guarded fallbacks."""
    best = 0
    d = 128
    while d <= min(S, max_tile):
        if S % d == 0:
            best = d
        d += 128
    if best:
        return best
    if S <= max_tile:
        return S
    best = 1
    for d in range(2, max_tile + 1):
        if S % d == 0:
            best = d
    return best


def _conv_pass_kernel(x_ref, wt_ref, y_ref, psum_ref, pm2_ref, xpad_ref, col_ref, *,
                      k, stride, pad, tile_h, out_w):
    """One output-row tile of the fused depthwise+pointwise conv + BN partial stats.

    x_ref    : (1, Cin, H, W)      unpadded input image (resident across row tiles)
    wt_ref   : (Cout, Cin*k*k)     fused tap weights (resident, constant)
    y_ref    : (1, Cout, St)       lane-dense pre-BN conv output tile, St = tile_h*Wo
    psum_ref : (1, Cout, 1)        per-batch running channel sum      (resident accumulator)
    pm2_ref  : (1, Cout, 1)        per-batch running channel M2 (Chan) (resident accumulator)
    xpad_ref : (Cin, Hp, Wp)       in-kernel zero-padded image scratch
    col_ref  : (Cin*k*k, St)       im2col patch stack scratch
    """
    cin = x_ref.shape[1]
    h, w = x_ref.shape[2], x_ref.shape[3]
    st = tile_h * out_w
    th_in = (tile_h - 1) * stride + k

    j = pl.program_id(1)

    # Build the zero-padded image once per batch (the input block, weights and this scratch
    # all stay resident while j sweeps the row tiles of the same image).
    @pl.when(j == 0)
    def _():
        if pad > 0:
            xpad_ref[...] = jnp.zeros(xpad_ref.shape, xpad_ref.dtype)
        xpad_ref[:, pad:pad + h, pad:pad + w] = x_ref[0]

    # Haloed row band for this output-row tile (dynamic start on the sublane axis).
    row0 = pl.multiple_of(j * (tile_h * stride), tile_h * stride)
    band = xpad_ref[:, pl.ds(row0, th_in), :]                     # (Cin, th_in, Wp)

    # im2col: stack the k*k taps along the contraction axis -> (Cin*k*k, St).
    for kh in range(k):
        for kw in range(k):
            t = kh * k + kw
            if stride == 1:
                patch = band[:, kh:kh + tile_h, kw:kw + out_w]
            else:
                hs_t = (tile_h - 1) * stride + 1
                ws = (out_w - 1) * stride + 1
                patch = band[:, kh:kh + hs_t:stride, kw:kw + ws:stride]
            col_ref[t * cin:(t + 1) * cin, :] = patch.reshape(cin, st)

    # One MXU matmul: K = Cin*k*k, lane-dense N = tile_h*Wo, f32 accumulation.
    acc = jnp.dot(wt_ref[...], col_ref[...], preferred_element_type=jnp.float32)

    y_ref[0] = acc.astype(y_ref.dtype)

    # Per-batch BatchNorm statistics from the f32 accumulator, folded across row tiles with
    # Chan's parallel-variance update (numerically robust, unlike E[x^2]-E[x]^2).
    cnt_t = float(st)
    sum_t = jnp.sum(acc, axis=1, keepdims=True)                   # (Cout, 1)
    mean_t = sum_t * (1.0 / cnt_t)
    m2_t = jnp.sum((acc - mean_t) ** 2, axis=1, keepdims=True)    # (Cout, 1)

    @pl.when(j == 0)
    def _():
        psum_ref[0] = sum_t
        pm2_ref[0] = m2_t

    @pl.when(j > 0)
    def _():
        n_prev = (j * st).astype(jnp.float32)
        sum_prev = psum_ref[0]
        mean_prev = sum_prev / n_prev
        delta = mean_t - mean_prev
        pm2_ref[0] = pm2_ref[0] + m2_t + (delta * delta) * (n_prev * cnt_t / (n_prev + cnt_t))
        psum_ref[0] = sum_prev + sum_t


def _bn_gelu_kernel(y_ref, scale_ref, shift_ref, o_ref):
    """Folded BatchNorm affine + exact-erf GELU on a lane-dense (Cout, sb) tile."""
    y = y_ref[0].astype(jnp.float32)                              # (Cout, sb)
    z = y * scale_ref[...] + shift_ref[...]                       # (Cout, 1) lane-broadcast
    g = 0.5 * z * (1.0 + lax.erf(z * (1.0 / math.sqrt(2.0))))
    o_ref[0] = g.astype(o_ref.dtype)


def conv_block(x, w_dw, w_pw, gamma, beta, *, k, s, p, eps=1e-5, tile_h=None):
    """x: (N, Cin, H, W) NCHW; w_dw: (Cin, 1, k, k); w_pw: (Cout, Cin, 1, 1)."""
    N, Cin, H, W = x.shape
    Cout = w_pw.shape[0]
    Ho = (H + 2 * p - k) // s + 1
    Wo = (W + 2 * p - k) // s + 1
    S = Ho * Wo
    Hp, Wp = H + 2 * p, W + 2 * p
    dtype = x.dtype
    itemsize = jnp.dtype(dtype).itemsize

    vmem_limit = _vmem_limit_bytes()
    if tile_h is None:
        tile_h = _pick_tile_h(H, W, Ho, Wo, Cin, Cout, k, s, p, itemsize, vmem_limit)
    assert Ho % tile_h == 0, "tile_h must divide the output height"
    RT = Ho // tile_h
    St = tile_h * Wo
    K = k * k * Cin

    # Fused depthwise+pointwise taps folded into ONE contraction axis:
    #   wt[o, t*Cin + c] = w_pw[o, c] * w_dw[c, 0, kh, kw],  t = kh*k + kw
    wdw = w_dw[:, 0, :, :].reshape(Cin, k * k)                        # (Cin, k*k)
    wt = (w_pw[:, :, 0, 0][:, None, :] * wdw.T[None, :, :])           # (Cout, k*k, Cin)
    wt = wt.reshape(Cout, K).astype(dtype)                            # bf16 stays bf16

    kernel = functools.partial(_conv_pass_kernel, k=k, stride=s, pad=p,
                               tile_h=tile_h, out_w=Wo)

    # ---- pass 1: fused conv (one matmul per row tile) + per-batch BN partial stats ----
    y, psum, pm2 = pl.pallas_call(
        kernel,
        grid=(N, RT),
        in_specs=[
            pl.BlockSpec((1, Cin, H, W), lambda n, j: (n, 0, 0, 0)),   # resident per batch
            pl.BlockSpec((Cout, K), lambda n, j: (0, 0)),              # constant weights
        ],
        out_specs=(
            pl.BlockSpec((1, Cout, St), lambda n, j: (n, 0, j)),       # lane-dense y tile
            pl.BlockSpec((1, Cout, 1), lambda n, j: (n, 0, 0)),        # per-batch sum
            pl.BlockSpec((1, Cout, 1), lambda n, j: (n, 0, 0)),        # per-batch M2
        ),
        out_shape=(
            jax.ShapeDtypeStruct((N, Cout, S), dtype),                 # y in input dtype
            jax.ShapeDtypeStruct((N, Cout, 1), jnp.float32),
            jax.ShapeDtypeStruct((N, Cout, 1), jnp.float32),
        ),
        scratch_shapes=[
            pltpu.VMEM((Cin, Hp, Wp), dtype),        # in-kernel zero-padded image
            pltpu.VMEM((K, St), dtype),              # im2col patch stack
        ],
        compiler_params=pltpu.CompilerParams(
            # batch axis feeds megacore; row-tile axis carries the padded-image scratch and
            # the BN stat accumulation, so it must stay "arbitrary".
            dimension_semantics=("parallel", "arbitrary"),
            vmem_limit_bytes=vmem_limit),
    )(x, wt)

    # ---- tiny global BN reduction + affine fold (training-mode biased variance) ----
    S_f = float(S)
    total = float(N) * S_f
    sums = psum[:, :, 0].astype(jnp.float32)                          # (N, Cout)
    m2s = pm2[:, :, 0].astype(jnp.float32)                            # (N, Cout)
    mean = jnp.sum(sums, axis=0) / total
    mean_b = sums / S_f
    var = (jnp.sum(m2s, axis=0) + S_f * jnp.sum((mean_b - mean) ** 2, axis=0)) / total
    inv = lax.rsqrt(var + eps)
    g32 = gamma.astype(jnp.float32)
    scale = (g32 * inv).reshape(Cout, 1)
    shift = (beta.astype(jnp.float32) - mean * g32 * inv).reshape(Cout, 1)

    # ---- pass 2: BN affine + GELU, lane-dense 128-multiple tiles, aliased onto y ----
    sb = _pick_lane_tile(S)
    out_flat = pl.pallas_call(
        _bn_gelu_kernel,
        grid=(N, S // sb),
        in_specs=[pl.BlockSpec((1, Cout, sb), lambda n, q: (n, 0, q)),
                  pl.BlockSpec((Cout, 1), lambda n, q: (0, 0)),
                  pl.BlockSpec((Cout, 1), lambda n, q: (0, 0))],
        out_specs=pl.BlockSpec((1, Cout, sb), lambda n, q: (n, 0, q)),
        out_shape=jax.ShapeDtypeStruct((N, Cout, S), dtype),
        input_output_aliases={0: 0},                      # reuse y's HBM buffer
        compiler_params=pltpu.CompilerParams(
            dimension_semantics=("parallel", "parallel"),
            vmem_limit_bytes=vmem_limit),
    )(y, scale, shift)

    return out_flat.reshape(N, Cout, Ho, Wo)              # free contiguous reshape, NCHW


def conv_block_reference(x, w_dw, w_pw, gamma, beta, *, k, s, p, eps=1e-5):
    """Pure-JAX reference (same math as the PyTorch module forward, training-mode BN)."""
    Cin = x.shape[1]
    dn = ("NCHW", "OIHW", "NCHW")
    y = lax.conv_general_dilated(x, w_dw, window_strides=(s, s),
                                 padding=((p, p), (p, p)),
                                 feature_group_count=Cin, dimension_numbers=dn)
    y = lax.conv_general_dilated(y, w_pw, window_strides=(1, 1),
                                 padding=((0, 0), (0, 0)), dimension_numbers=dn)
    mean = jnp.mean(y, axis=(0, 2, 3), keepdims=True)
    var = jnp.mean((y - mean) ** 2, axis=(0, 2, 3), keepdims=True)
    yhat = (y - mean) / jnp.sqrt(var + eps)
    yaff = yhat * gamma.reshape(1, -1, 1, 1) + beta.reshape(1, -1, 1, 1)
    return 0.5 * yaff * (1.0 + lax.erf(yaff / math.sqrt(2.0)))


if __name__ == "__main__":
    # small shapes: batch=2, in_channels=4, out_channels=8, spatial=16
    N, Cin, Cout, H, W = 2, 4, 8, 16, 16

    key = jax.random.PRNGKey(0)
    kx, kdw, kpw, kg, kb, kdw5 = jax.random.split(key, 6)
    x = jax.random.normal(kx, (N, Cin, H, W), jnp.float32)
    gamma = 1.0 + 0.1 * jax.random.normal(kg, (Cout,), jnp.float32)     # BN weight
    beta = 0.1 * jax.random.normal(kb, (Cout,), jnp.float32)            # BN bias

    # --- config 1: k=3, s=1, p=1, default tile selection ---
    k, s, p = 3, 1, 1
    w_dw = 0.2 * jax.random.normal(kdw, (Cin, 1, k, k), jnp.float32)    # depthwise OIHW
    w_pw = 0.2 * jax.random.normal(kpw, (Cout, Cin, 1, 1), jnp.float32)  # pointwise OIHW

    ref = conv_block_reference(x, w_dw, w_pw, gamma, beta, k=k, s=s, p=p)

    out = jax.block_until_ready(
        jax.jit(functools.partial(conv_block, k=k, s=s, p=p))(x, w_dw, w_pw, gamma, beta))
    assert out.shape == (N, Cout, H, W)
    assert jnp.allclose(out, ref, rtol=1e-4, atol=1e-4), float(jnp.max(jnp.abs(out - ref)))

    # --- same config, forced row tiling (2 row tiles: exercises halo band + stat combine) ---
    out2 = jax.block_until_ready(
        jax.jit(functools.partial(conv_block, k=k, s=s, p=p, tile_h=8))(
            x, w_dw, w_pw, gamma, beta))
    assert jnp.allclose(out2, ref, rtol=1e-4, atol=1e-4), float(jnp.max(jnp.abs(out2 - ref)))

    # --- config 2: k=5, s=1, p=2 with forced row tiling (wider halo) ---
    k5, p5 = 5, 2
    w_dw5 = 0.2 * jax.random.normal(kdw5, (Cin, 1, k5, k5), jnp.float32)
    ref3 = conv_block_reference(x, w_dw5, w_pw, gamma, beta, k=k5, s=s, p=p5)
    out3 = jax.block_until_ready(
        jax.jit(functools.partial(conv_block, k=k5, s=s, p=p5, tile_h=8))(
            x, w_dw5, w_pw, gamma, beta))
    assert jnp.allclose(out3, ref3, rtol=1e-4, atol=1e-4), float(jnp.max(jnp.abs(out3 - ref3)))

    print("KERNEL_OK")
</pallas_src>

<mosaic_0001>
module attributes {stable_mosaic.version = 11 : i64} {
  func.func @_conv_pass_kernel(%arg0: i32, %arg1: i32, %arg2: memref<1x4x16x16xf32, #tpu.memory_space<vmem>>, %arg3: memref<8x36xf32, #tpu.memory_space<vmem>>, %arg4: memref<1x8x256xf32, #tpu.memory_space<vmem>>, %arg5: memref<1x8x1xf32, #tpu.memory_space<vmem>>, %arg6: memref<1x8x1xf32, #tpu.memory_space<vmem>>, %arg7: memref<4x18x18xf32, #tpu.memory_space<vmem>>, %arg8: memref<36x256xf32, #tpu.memory_space<vmem>>) attributes {dimension_semantics = [#tpu.dimension_semantics<parallel>, #tpu.dimension_semantics<arbitrary>], iteration_bounds = array<i64: 2, 1>, scalar_prefetch = 0 : i64, scratch_operands = 2 : i64, tpu.core_type = #tpu.core_type<tc>, window_params = [{transform_indices = @transform_0, window_bounds = array<i64: 1, 4, 16, 16>}, {pipeline_mode = #tpu.pipeline_mode<synchronous>, transform_indices = @transform_1, window_bounds = array<i64: 8, 36>}, {transform_indices = @transform_2, window_bounds = array<i64: 1, 8, 256>}, {transform_indices = @transform_3, window_bounds = array<i64: 1, 8, 1>}, {transform_indices = @transform_4, window_bounds = array<i64: 1, 8, 1>}]} {
    %c0_i32 = arith.constant 0 : i32
    %0 = arith.cmpi eq, %arg1, %c0_i32 : i32
    %1 = arith.extui %0 : i1 to i32
    %c0_i32_0 = arith.constant 0 : i32
    %2 = arith.cmpi ne, %1, %c0_i32_0 : i32
    scf.if %2 {
      %cst_26 = arith.constant 0.000000e+00 : f32
      %55 = vector.broadcast %cst_26 : f32 to vector<4x18x18xf32>
      %c0_27 = arith.constant 0 : index
      %c0_28 = arith.constant 0 : index
      %c0_29 = arith.constant 0 : index
      %56 = vector.load %arg7[%c0_27, %c0_28, %c0_29] : memref<4x18x18xf32, #tpu.memory_space<vmem>>, vector<4x18x18xf32>
      tpu.vector_store %arg7[%c0_27, %c0_28, %c0_29], %55 {strides = array<i32>} : memref<4x18x18xf32, #tpu.memory_space<vmem>>, vector<4x18x18xf32>,
      %c0_30 = arith.constant 0 : index
      %c0_31 = arith.constant 0 : index
      %c0_32 = arith.constant 0 : index
      %c0_33 = arith.constant 0 : index
      %57 = vector.load %arg2[%c0_30, %c0_31, %c0_32, %c0_33] : memref<1x4x16x16xf32, #tpu.memory_space<vmem>>, vector<1x4x16x16xf32>
      %58 = vector.shape_cast %57 : vector<1x4x16x16xf32> to vector<4x16x16xf32>
      %c0_34 = arith.constant 0 : index
      %c1 = arith.constant 1 : index
      %c1_35 = arith.constant 1 : index
      %59 = vector.load %arg7[%c0_34, %c1, %c1_35] : memref<4x18x18xf32, #tpu.memory_space<vmem>>, vector<4x16x16xf32>
      tpu.vector_store %arg7[%c0_34, %c1, %c1_35], %58 {strides = array<i32>} : memref<4x18x18xf32, #tpu.memory_space<vmem>>, vector<4x16x16xf32>,
    } else {
    }
    %c16_i32 = arith.constant 16 : i32
    %3 = arith.muli %arg1, %c16_i32 : i32
    %4 = tpu.assume_multiple %3, 16 : i32
    %c0 = arith.constant 0 : index
    %5 = arith.index_cast %4 : i32 to index
    %c0_1 = arith.constant 0 : index
    %6 = vector.load %arg7[%c0, %5, %c0_1] : memref<4x18x18xf32, #tpu.memory_space<vmem>>, vector<4x18x18xf32>
    %7 = vector.extract_strided_slice %6 {offsets = [0, 0, 0], sizes = [4, 16, 16], strides = [1, 1, 1]} : vector<4x18x18xf32> to vector<4x16x16xf32>
    %8 = vector.shape_cast %7 : vector<4x16x16xf32> to vector<4x256xf32>
    %c0_2 = arith.constant 0 : index
    %c0_3 = arith.constant 0 : index
    %9 = vector.load %arg8[%c0_2, %c0_3] : memref<36x256xf32, #tpu.memory_space<vmem>>, vector<4x256xf32>
    tpu.vector_store %arg8[%c0_2, %c0_3], %8 {strides = array<i32>} : memref<36x256xf32, #tpu.memory_space<vmem>>, vector<4x256xf32>,
    %10 = vector.extract_strided_slice %6 {offsets = [0, 0, 1], sizes = [4, 16, 16], strides = [1, 1, 1]} : vector<4x18x18xf32> to vector<4x16x16xf32>
    %11 = vector.shape_cast %10 : vector<4x16x16xf32> to vector<4x256xf32>
    %c4 = arith.constant 4 : index
    %c0_4 = arith.constant 0 : index
    %12 = vector.load %arg8[%c4, %c0_4] : memref<36x256xf32, #tpu.memory_space<vmem>>, vector<4x256xf32>
    tpu.vector_store %arg8[%c4, %c0_4], %11 {strides = array<i32>} : memref<36x256xf32, #tpu.memory_space<vmem>>, vector<4x256xf32>,
    %13 = vector.extract_strided_slice %6 {offsets = [0, 0, 2], sizes = [4, 16, 16], strides = [1, 1, 1]} : vector<4x18x18xf32> to vector<4x16x16xf32>
    %14 = vector.shape_cast %13 : vector<4x16x16xf32> to vector<4x256xf32>
    %c8 = arith.constant 8 : index
    %c0_5 = arith.constant 0 : index
    %15 = vector.load %arg8[%c8, %c0_5] : memref<36x256xf32, #tpu.memory_space<vmem>>, vector<4x256xf32>
    tpu.vector_store %arg8[%c8, %c0_5], %14 {strides = array<i32>} : memref<36x256xf32, #tpu.memory_space<vmem>>, vector<4x256xf32>,
    %16 = vector.extract_strided_slice %6 {offsets = [0, 1, 0], sizes = [4, 16, 16], strides = [1, 1, 1]} : vector<4x18x18xf32> to vector<4x16x16xf32>
    %17 = vector.shape_cast %16 : vector<4x16x16xf32> to vector<4x256xf32>
    %c12 = arith.constant 12 : index
    %c0_6 = arith.constant 0 : index
    %18 = vector.load %arg8[%c12, %c0_6] : memref<36x256xf32, #tpu.memory_space<vmem>>, vector<4x256xf32>
    tpu.vector_store %arg8[%c12, %c0_6], %17 {strides = array<i32>} : memref<36x256xf32, #tpu.memory_space<vmem>>, vector<4x256xf32>,
    %19 = vector.extract_strided_slice %6 {offsets = [0, 1, 1], sizes = [4, 16, 16], strides = [1, 1, 1]} : vector<4x18x18xf32> to vector<4x16x16xf32>
    %20 = vector.shape_cast %19 : vector<4x16x16xf32> to vector<4x256xf32>
    %c16 = arith.constant 16 : index
    %c0_7 = arith.constant 0 : index
    %21 = vector.load %arg8[%c16, %c0_7] : memref<36x256xf32, #tpu.memory_space<vmem>>, vector<4x256xf32>
    tpu.vector_store %arg8[%c16, %c0_7], %20 {strides = array<i32>} : memref<36x256xf32, #tpu.memory_space<vmem>>, vector<4x256xf32>,
    %22 = vector.extract_strided_slice %6 {offsets = [0, 1, 2], sizes = [4, 16, 16], strides = [1, 1, 1]} : vector<4x18x18xf32> to vector<4x16x16xf32>
    %23 = vector.shape_cast %22 : vector<4x16x16xf32> to vector<4x256xf32>
    %c20 = arith.constant 20 : index
    %c0_8 = arith.constant 0 : index
    %24 = vector.load %arg8[%c20, %c0_8] : memref<36x256xf32, #tpu.memory_space<vmem>>, vector<4x256xf32>
    tpu.vector_store %arg8[%c20, %c0_8], %23 {strides = array<i32>} : memref<36x256xf32, #tpu.memory_space<vmem>>, vector<4x256xf32>,
    %25 = vector.extract_strided_slice %6 {offsets = [0, 2, 0], sizes = [4, 16, 16], strides = [1, 1, 1]} : vector<4x18x18xf32> to vector<4x16x16xf32>
    %26 = vector.shape_cast %25 : vector<4x16x16xf32> to vector<4x256xf32>
    %c24 = arith.constant 24 : index
    %c0_9 = arith.constant 0 : index
    %27 = vector.load %arg8[%c24, %c0_9] : memref<36x256xf32, #tpu.memory_space<vmem>>, vector<4x256xf32>
    tpu.vector_store %arg8[%c24, %c0_9], %26 {strides = array<i32>} : memref<36x256xf32, #tpu.memory_space<vmem>>, vector<4x256xf32>,
    %28 = vector.extract_strided_slice %6 {offsets = [0, 2, 1], sizes = [4, 16, 16], strides = [1, 1, 1]} : vector<4x18x18xf32> to vector<4x16x16xf32>
    %29 = vector.shape_cast %28 : vector<4x16x16xf32> to vector<4x256xf32>
    %c28 = arith.constant 28 : index
    %c0_10 = arith.constant 0 : index
    %30 = vector.load %arg8[%c28, %c0_10] : memref<36x256xf32, #tpu.memory_space<vmem>>, vector<4x256xf32>
    tpu.vector_store %arg8[%c28, %c0_10], %29 {strides = array<i32>} : memref<36x256xf32, #tpu.memory_space<vmem>>, vector<4x256xf32>,
    %31 = vector.extract_strided_slice %6 {offsets = [0, 2, 2], sizes = [4, 16, 16], strides = [1, 1, 1]} : vector<4x18x18xf32> to vector<4x16x16xf32>
    %32 = vector.shape_cast %31 : vector<4x16x16xf32> to vector<4x256xf32>
    %c32 = arith.constant 32 : index
    %c0_11 = arith.constant 0 : index
    %33 = vector.load %arg8[%c32, %c0_11] : memref<36x256xf32, #tpu.memory_space<vmem>>, vector<4x256xf32>
    tpu.vector_store %arg8[%c32, %c0_11], %32 {strides = array<i32>} : memref<36x256xf32, #tpu.memory_space<vmem>>, vector<4x256xf32>,
    %c0_12 = arith.constant 0 : index
    %c0_13 = arith.constant 0 : index
    %34 = vector.load %arg3[%c0_12, %c0_13] : memref<8x36xf32, #tpu.memory_space<vmem>>, vector<8x36xf32>
    %c0_14 = arith.constant 0 : index
    %c0_15 = arith.constant 0 : index
    %35 = vector.load %arg8[%c0_14, %c0_15] : memref<36x256xf32, #tpu.memory_space<vmem>>, vector<36x256xf32>
    %cst = arith.constant dense<0.000000e+00> : vector<8x256xf32>
    %36 = tpu.matmul %34, %35, %cst {dimension_numbers = #tpu.dot_dimension_numbers<[1], [0], [0], [1], [0, 0, 1, 1], [], []>} : vector<8x36xf32>, vector<36x256xf32>, vector<8x256xf32> -> vector<8x256xf32>
    %c0_16 = arith.constant 0 : index
    %c0_17 = arith.constant 0 : index
    %c0_18 = arith.constant 0 : index
    %37 = vector.load %arg4[%c0_16, %c0_17, %c0_18] : memref<1x8x256xf32, #tpu.memory_space<vmem>>, vector<1x8x256xf32>
    %38 = vector.shape_cast %37 : vector<1x8x256xf32> to vector<8x256xf32>
    %39 = vector.shape_cast %36 : vector<8x256xf32> to vector<1x8x256xf32>
    tpu.vector_store %arg4[%c0_16, %c0_17, %c0_18], %39 {strides = array<i32>} : memref<1x8x256xf32, #tpu.memory_space<vmem>>, vector<1x8x256xf32>,
    %cst_19 = arith.constant dense<0.000000e+00> : vector<8xf32>
    %40 = vector.multi_reduction <add>, %36, %cst_19 [1] : vector<8x256xf32> to vector<8xf32>
    %41 = vector.shape_cast %40 : vector<8xf32> to vector<8x1xf32>
    %cst_20 = arith.constant 3.906250e-03 : f32
    %42 = vector.broadcast %cst_20 : f32 to vector<8x1xf32>
    %43 = arith.mulf %41, %42 : vector<8x1xf32>
    %44 = vector.broadcast %43 : vector<8x1xf32> to vector<8x256xf32>
    %45 = arith.subf %36, %44 : vector<8x256xf32>
    %46 = arith.mulf %45, %45 : vector<8x256xf32>
    %cst_21 = arith.constant dense<0.000000e+00> : vector<8xf32>
    %47 = vector.multi_reduction <add>, %46, %cst_21 [1] : vector<8x256xf32> to vector<8xf32>
    %48 = vector.shape_cast %47 : vector<8xf32> to vector<8x1xf32>
    %c0_i32_22 = arith.constant 0 : i32
    %49 = arith.cmpi eq, %arg1, %c0_i32_22 : i32
    %50 = arith.extui %49 : i1 to i32
    %c0_i32_23 = arith.constant 0 : i32
    %51 = arith.cmpi ne, %50, %c0_i32_23 : i32
    scf.if %51 {
      %c0_26 = arith.constant 0 : index
      %c0_27 = arith.constant 0 : index
      %c0_28 = arith.constant 0 : index
      %55 = vector.load %arg5[%c0_26, %c0_27, %c0_28] : memref<1x8x1xf32, #tpu.memory_space<vmem>>, vector<1x8x1xf32>
      %56 = vector.shape_cast %55 : vector<1x8x1xf32> to vector<8x1xf32>
      %57 = vector.shape_cast %41 : vector<8x1xf32> to vector<1x8x1xf32>
      tpu.vector_store %arg5[%c0_26, %c0_27, %c0_28], %57 {strides = array<i32>} : memref<1x8x1xf32, #tpu.memory_space<vmem>>, vector<1x8x1xf32>,
      %c0_29 = arith.constant 0 : index
      %c0_30 = arith.constant 0 : index
      %c0_31 = arith.constant 0 : index
      %58 = vector.load %arg6[%c0_29, %c0_30, %c0_31] : memref<1x8x1xf32, #tpu.memory_space<vmem>>, vector<1x8x1xf32>
      %59 = vector.shape_cast %58 : vector<1x8x1xf32> to vector<8x1xf32>
      %60 = vector.shape_cast %48 : vector<8x1xf32> to vector<1x8x1xf32>
      tpu.vector_store %arg6[%c0_29, %c0_30, %c0_31], %60 {strides = array<i32>} : memref<1x8x1xf32, #tpu.memory_space<vmem>>, vector<1x8x1xf32>,
    } else {
    }
    %c0_i32_24 = arith.constant 0 : i32
    %52 = arith.cmpi sgt, %arg1, %c0_i32_24 : i32
    %53 = arith.extui %52 : i1 to i32
    %c0_i32_25 = arith.constant 0 : i32
    %54 = arith.cmpi ne, %53, %c0_i32_25 : i32
    scf.if %54 {
      %c256_i32 = arith.constant 256 : i32
      %55 = arith.muli %arg1, %c256_i32 : i32
      %56 = arith.sitofp %55 : i32 to f32
      %c0_26 = arith.constant 0 : index
      %c0_27 = arith.constant 0 : index
      %c0_28 = arith.constant 0 : index
      %57 = vector.load %arg5[%c0_26, %c0_27, %c0_28] : memref<1x8x1xf32, #tpu.memory_space<vmem>>, vector<1x8x1xf32>
      %58 = vector.shape_cast %57 : vector<1x8x1xf32> to vector<8x1xf32>
      %59 = vector.broadcast %56 : f32 to vector<8x1xf32>
      %60 = arith.divf %58, %59 : vector<8x1xf32>
      %61 = arith.subf %43, %60 : vector<8x1xf32>
      %c0_29 = arith.constant 0 : index
      %c0_30 = arith.constant 0 : index
      %c0_31 = arith.constant 0 : index
      %62 = vector.load %arg6[%c0_29, %c0_30, %c0_31] : memref<1x8x1xf32, #tpu.memory_space<vmem>>, vector<1x8x1xf32>
      %63 = vector.shape_cast %62 : vector<1x8x1xf32> to vector<8x1xf32>
      %64 = arith.addf %63, %48 : vector<8x1xf32>
      %65 = arith.mulf %61, %61 : vector<8x1xf32>
      %cst_32 = arith.constant 2.560000e+02 : f32
      %66 = arith.mulf %56, %cst_32 : f32
      %cst_33 = arith.constant 2.560000e+02 : f32
      %67 = arith.addf %56, %cst_33 : f32
      %68 = arith.divf %66, %67 : f32
      %69 = vector.broadcast %68 : f32 to vector<8x1xf32>
      %70 = arith.mulf %65, %69 : vector<8x1xf32>
      %71 = arith.addf %64, %70 : vector<8x1xf32>
      %c0_34 = arith.constant 0 : index
      %c0_35 = arith.constant 0 : index
      %c0_36 = arith.constant 0 : index
      %72 = vector.load %arg6[%c0_34, %c0_35, %c0_36] : memref<1x8x1xf32, #tpu.memory_space<vmem>>, vector<1x8x1xf32>
      %73 = vector.shape_cast %72 : vector<1x8x1xf32> to vector<8x1xf32>
      %74 = vector.shape_cast %71 : vector<8x1xf32> to vector<1x8x1xf32>
      tpu.vector_store %arg6[%c0_34, %c0_35, %c0_36], %74 {strides = array<i32>} : memref<1x8x1xf32, #tpu.memory_space<vmem>>, vector<1x8x1xf32>,
      %75 = arith.addf %58, %41 : vector<8x1xf32>
      %c0_37 = arith.constant 0 : index
      %c0_38 = arith.constant 0 : index
      %c0_39 = arith.constant 0 : index
      %76 = vector.load %arg5[%c0_37, %c0_38, %c0_39] : memref<1x8x1xf32, #tpu.memory_space<vmem>>, vector<1x8x1xf32>
      %77 = vector.shape_cast %76 : vector<1x8x1xf32> to vector<8x1xf32>
      %78 = vector.shape_cast %75 : vector<8x1xf32> to vector<1x8x1xf32>
      tpu.vector_store %arg5[%c0_37, %c0_38, %c0_39], %78 {strides = array<i32>} : memref<1x8x1xf32, #tpu.memory_space<vmem>>, vector<1x8x1xf32>,
    } else {
    }
    return
  }
  func.func @transform_0(%arg0: i32, %arg1: i32) -> (i32, i32, i32, i32) {
    %c0_i32 = arith.constant 0 : i32
    %c0_i32_0 = arith.constant 0 : i32
    %c0_i32_1 = arith.constant 0 : i32
    %c0_i32_2 = arith.constant 0 : i32
    return %arg0, %c0_i32, %c0_i32_0, %c0_i32_1 : i32, i32, i32, i32
  }
  func.func @transform_1(%arg0: i32, %arg1: i32) -> (i32, i32) {
    %c0_i32 = arith.constant 0 : i32
    %c0_i32_0 = arith.constant 0 : i32
    %c0_i32_1 = arith.constant 0 : i32
    return %c0_i32, %c0_i32_0 : i32, i32
  }
  func.func @transform_2(%arg0: i32, %arg1: i32) -> (i32, i32, i32) {
    %c0_i32 = arith.constant 0 : i32
    %c0_i32_0 = arith.constant 0 : i32
    return %arg0, %c0_i32, %arg1 : i32, i32, i32
  }
  func.func @transform_3(%arg0: i32, %arg1: i32) -> (i32, i32, i32) {
    %c0_i32 = arith.constant 0 : i32
    %c0_i32_0 = arith.constant 0 : i32
    %c0_i32_1 = arith.constant 0 : i32
    return %arg0, %c0_i32, %c0_i32_0 : i32, i32, i32
  }
  func.func @transform_4(%arg0: i32, %arg1: i32) -> (i32, i32, i32) {
    %c0_i32 = arith.constant 0 : i32
    %c0_i32_0 = arith.constant 0 : i32
    %c0_i32_1 = arith.constant 0 : i32
    return %arg0, %c0_i32, %c0_i32_0 : i32, i32, i32
  }
}

module attributes {stable_mosaic.version = 11 : i64} {
  func.func @_bn_gelu_kernel(%arg0: i32, %arg1: i32, %arg2: memref<1x8x256xf32, #tpu.memory_space<vmem>>, %arg3: memref<8x1xf32, #tpu.memory_space<vmem>>, %arg4: memref<8x1xf32, #tpu.memory_space<vmem>>, %arg5: memref<1x8x256xf32, #tpu.memory_space<vmem>>) attributes {dimension_semantics = [#tpu.dimension_semantics<parallel>, #tpu.dimension_semantics<parallel>], iteration_bounds = array<i64: 2, 1>, scalar_prefetch = 0 : i64, scratch_operands = 0 : i64, tpu.core_type = #tpu.core_type<tc>, window_params = [{transform_indices = @transform_0, window_bounds = array<i64: 1, 8, 256>}, {pipeline_mode = #tpu.pipeline_mode<synchronous>, transform_indices = @transform_1, window_bounds = array<i64: 8, 1>}, {pipeline_mode = #tpu.pipeline_mode<synchronous>, transform_indices = @transform_2, window_bounds = array<i64: 8, 1>}, {transform_indices = @transform_3, window_bounds = array<i64: 1, 8, 256>}]} {
    %c0 = arith.constant 0 : index
    %c0_0 = arith.constant 0 : index
    %c0_1 = arith.constant 0 : index
    %0 = vector.load %arg2[%c0, %c0_0, %c0_1] : memref<1x8x256xf32, #tpu.memory_space<vmem>>, vector<1x8x256xf32>
    %1 = vector.shape_cast %0 : vector<1x8x256xf32> to vector<8x256xf32>
    %c0_2 = arith.constant 0 : index
    %c0_3 = arith.constant 0 : index
    %2 = vector.load %arg3[%c0_2, %c0_3] : memref<8x1xf32, #tpu.memory_space<vmem>>, vector<8x1xf32>
    %3 = vector.broadcast %2 : vector<8x1xf32> to vector<8x256xf32>
    %4 = arith.mulf %1, %3 : vector<8x256xf32>
    %c0_4 = arith.constant 0 : index
    %c0_5 = arith.constant 0 : index
    %5 = vector.load %arg4[%c0_4, %c0_5] : memref<8x1xf32, #tpu.memory_space<vmem>>, vector<8x1xf32>
    %6 = vector.broadcast %5 : vector<8x1xf32> to vector<8x256xf32>
    %7 = arith.addf %4, %6 : vector<8x256xf32>
    %cst = arith.constant 5.000000e-01 : f32
    %8 = vector.broadcast %cst : f32 to vector<8x256xf32>
    %9 = arith.mulf %8, %7 : vector<8x256xf32>
    %cst_6 = arith.constant 0.707106769 : f32
    %10 = vector.broadcast %cst_6 : f32 to vector<8x256xf32>
    %11 = arith.mulf %7, %10 : vector<8x256xf32>
    %12 = math.erf %11 : vector<8x256xf32>
    %cst_7 = arith.constant 1.000000e+00 : f32
    %13 = vector.broadcast %cst_7 : f32 to vector<8x256xf32>
    %14 = arith.addf %13, %12 : vector<8x256xf32>
    %15 = arith.mulf %9, %14 : vector<8x256xf32>
    %c0_8 = arith.constant 0 : index
    %c0_9 = arith.constant 0 : index
    %c0_10 = arith.constant 0 : index
    %16 = vector.load %arg5[%c0_8, %c0_9, %c0_10] : memref<1x8x256xf32, #tpu.memory_space<vmem>>, vector<1x8x256xf32>
    %17 = vector.shape_cast %16 : vector<1x8x256xf32> to vector<8x256xf32>
    %18 = vector.shape_cast %15 : vector<8x256xf32> to vector<1x8x256xf32>
    tpu.vector_store %arg5[%c0_8, %c0_9, %c0_10], %18 {strides = array<i32>} : memref<1x8x256xf32, #tpu.memory_space<vmem>>, vector<1x8x256xf32>,
    return
  }
  func.func @transform_0(%arg0: i32, %arg1: i32) -> (i32, i32, i32) {
    %c0_i32 = arith.constant 0 : i32
    %c0_i32_0 = arith.constant 0 : i32
    return %arg0, %c0_i32, %arg1 : i32, i32, i32
  }
  func.func @transform_1(%arg0: i32, %arg1: i32) -> (i32, i32) {
    %c0_i32 = arith.constant 0 : i32
    %c0_i32_0 = arith.constant 0 : i32
    %c0_i32_1 = arith.constant 0 : i32
    return %c0_i32, %c0_i32_0 : i32, i32
  }
  func.func @transform_2(%arg0: i32, %arg1: i32) -> (i32, i32) {
    %c0_i32 = arith.constant 0 : i32
    %c0_i32_0 = arith.constant 0 : i32
    %c0_i32_1 = arith.constant 0 : i32
    return %c0_i32, %c0_i32_0 : i32, i32
  }
  func.func @transform_3(%arg0: i32, %arg1: i32) -> (i32, i32, i32) {
    %c0_i32 = arith.constant 0 : i32
    %c0_i32_0 = arith.constant 0 : i32
    return %arg0, %c0_i32, %arg1 : i32, i32, i32
  }
}

</mosaic_0001>

<bundles_post_ra>
// kernel: conv_block.3
= control target key start
LH: loop header
LB: loop body
LE: loop exit
PB: predicated region body
PF: predicated region fallthrough
CT: control target
= control target key end

     0   :  { %s415_s12 = smov 0   ;;  %s417_s13 = smov 0   ;;  %s454_s0 = inlined_call_operand.vmem [shape: f32[2,8,256], index: 0, kind: input, shape index: {}, may-alias: {0,3}]   ;;  %s455_s1 = inlined_call_operand.vmem [shape: f32[8,1], index: 1, kind: input, shape index: {}]   ;;  %s456_s2 = inlined_call_operand.vmem [shape: f32[8,1], index: 2, kind: input, shape index: {}]   ;;  %s457_s3 = inlined_call_operand.vmem [shape: f32[2,8,256], index: 3, kind: output, shape index: {}, may-alias: {0,3}]  }
   0x1   :  { %s419_s14 = smov 0  }
   0x2 LB: > { %s25_s15 = sadd.s32 1, %s388_s13  ;;  %p331_p0 = scmp.ge.s32.totalorder %s392_s14, 1  ;;  %s392_s14 = sphi %s419_s14, %s13_s14   ;;  %s388_s13 = sphi %s417_s13, %s459_s13   ;;  %s384_s12 = sphi %s415_s12, %s458_s12  }
   0x3   : > { %p27_p1 = scmp.ge.s32.totalorder %s25_s15, 2  ;;  %p158_p2 = scmp.lt.s32.totalorder %s392_s14, 3 }
   0x5   : > { %s461_s15 = smov (%p27_p1, %s25_s15), 0  ;;  %p159_p3 = pnand %p331_p0, %p158_p2 }
   0x6   : > { %p191_p4 = scmp.lt.s32.totalorder (!%p159_p3), %s384_s12, 1 }
   0x7   : > { %162 = sbr.rel (%p159_p3) target bundleno = 166 (0xa6), region = 32 }
   0xc   : > { %v212_v0 = vld [vmem:[%s455_s1] sm:$0xff]  ;;  %v394_v1 = vmov 0   ;;  %s463_s12 = smov (!%p191_p4, %s384_s12), 1 }
   0xd   : > { %365 = vset.pattern.permute.xlu0 %v394_v1  ;;  %v220_v2 = vld [vmem:[%s456_s2] sm:$0xff]  ;;  %s338_s20 = sshll.u32 %s463_s12, 4 }
   0xe   : > { %215 = vperm.xlu0 %365, %v212_v0   ;;  %s198_s23 = scalar_lea.vmem %s454_s0, %s338_s20  ;;  %s208_s26 = scalar_lea.vmem %s457_s3, %s338_s20 }
   0xf   : > { %v210_v4 = vld [vmem:[%s198_s23] sm:$0xff]  ;;  %v211_v5 = vld [vmem:[%s198_s23 + $0x8] sm:$0xff] }
  0x12   : > { %223 = vperm.xlu0 %365, %v220_v2  }
  0x89   : > { %v216_v3 = vpop.permute.xlu0 %215 }
  0x8a   : > { %v218_v6 = vmul.f32 %v216_v3, %v210_v4  ;;  %v219_v7 = vmul.f32 %v216_v3, %v211_v5 }
  0x8d   : > { %v224_v8 = vpop.permute.xlu0 %223 }
  0x8e   : > { %v226_v9 = vadd.f32 %v224_v8, %v218_v6  ;;  %v227_v10 = vadd.f32 %v224_v8, %v219_v7 }
  0x90   : > { %v230_v11 = vmul.f32 0.70710677, %v226_v9  ;;  %v231_v12 = vmul.f32 0.70710677, %v227_v10  ;;  %v228_v15 = vmul.f32 0.5, %v226_v9  ;;  %v229_v17 = vmul.f32 0.5, %v227_v10 }
  0x92   : > { %366 = verf.f32 %v230_v11 }
  0x93   : > { %368 = verf.f32 %v231_v12 }
  0x9f   : > { %v367_v13 = vpop.eup %366 }
  0xa0   : > { %v369_v14 = vpop.eup %368  ;;  %v234_v16 = vadd.f32 1.0, %v367_v13 }
  0xa1   : > { %v235_v18 = vadd.f32 1.0, %v369_v14 }
  0xa2   : > { %v236_v19 = vmul.f32 %v234_v16, %v228_v15 }
  0xa3   : > { %v237_v20 = vmul.f32 %v235_v18, %v229_v17 }
  0xa4   : > { %238 = vst [vmem:[%s208_s26] sm:$0xff] %v236_v19 }
  0xa5   : > { %239 = vst [vmem:[%s208_s26 + $0x8] sm:$0xff] %v237_v20 }
  0xa6 PF: > { %s13_s14 = sadd.s32 1, %s392_s14   ;;  %s458_s12 = smov %s388_s13 }
  0xa7   : > { %p10_p5 = scmp.ge.s32.totalorder %s13_s14, 4   ;;  %s459_s13 = smov %s461_s15 }
  0xa9   :  { %12 = sbr.rel (!%p10_p5) target bundleno = 2 (0x2), region = 62 }

// kernel: conv_block.2
= control target key start
LH: loop header
LB: loop body
LE: loop exit
PB: predicated region body
PF: predicated region fallthrough
CT: control target
= control target key end

     0   :  { %s2849_s15 = smov 0   ;;  %s2851_s16 = smov 0   ;;  %s4426_s0 = inlined_call_operand.vmem [shape: f32[2,4,16,16], index: 0, kind: input, shape index: {}]   ;;  %s4427_s1 = inlined_call_operand.vmem [shape: f32[8,36], index: 1, kind: input, shape index: {}]   ;;  %s4428_s2 = inlined_call_operand.vmem [shape: f32[2,8,256], index: 2, kind: output, shape index: {0}]   ;;  %s4429_s3 = inlined_call_operand.vmem [shape: f32[2,8,1], index: 3, kind: output, shape index: {1}]   ;;  %s4430_s4 = inlined_call_operand.vmem [shape: f32[2,8,1], index: 4, kind: output, shape index: {2}]  }
   0x1   :  { %s2853_s17 = smov 0  }
   0x2 LB: > { %s27_s18 = sadd.s32 1, %s2805_s16  ;;  %p2728_p0 = scmp.ge.s32.totalorder %s2809_s17, 1  ;;  %s2809_s17 = sphi %s2853_s17, %s15_s17   ;;  %s2805_s16 = sphi %s2851_s16, %s4602_s16   ;;  %s2801_s15 = sphi %s2849_s15, %s4601_s15  }
   0x3   : > { %p29_p1 = scmp.ge.s32.totalorder %s27_s18, 2  ;;  %p181_p2 = scmp.lt.s32.totalorder %s2809_s17, 3 }
   0x5   : > { %s4604_s18 = smov (%p29_p1, %s27_s18), 0  ;;  %p182_p3 = pnand %p2728_p0, %p181_p2 }
   0x7   : > { %185 = sbr.rel (%p182_p3) target bundleno = 1144 (0x478), region = 28 }
   0xc   : > { %p219_p4 = scmp.lt.s32.totalorder %s2801_s15, 1  ;;  %vm246_vm0 = vcmask 146432   ;;  %vm249_vm1 = vcmask 140288   ;;  %v4435_v0 = vmov 0.0   ;;  %s2812_s23 = smov 1   ;;  %vm300_vm2 = vcmask 138248  }
   0xd   : > { %251 = vst.msk [vmem:[#allocation2 + $0x18] sm:$0xff] %vm246_vm0, %v4435_v0  ;;  %252 = vst.msk [vmem:[#allocation2 + $0x20] sm:$0xff] %vm246_vm0, %v4435_v0  ;;  %2526 = vmatprep.mubr.f32.mxu0 %v4435_v0  ;;  %s2813_s24 = smov 127   ;;  %vm1733_vm3 = vcmask 1045504   ;;  %s2814_s25 = smov 126   ;;  %v328_v42 = vlaneseq  ;;  %vm1020_vm4 = vcmask 1046528  }
   0xe   : > { %247 = vst.msk [vmem:[#allocation2] sm:$0xff] %vm246_vm0, %v4435_v0  ;;  %248 = vst.msk [vmem:[#allocation2 + $0x8] sm:$0xff] %vm246_vm0, %v4435_v0  ;;  %s4606_s15 = smov (!%p219_p4, %s2801_s15), 1  ;;  %v2815_v40 = vmov 1983009808   ;;  %s2817_s26 = smov 32  }
   0xf   : > { %254 = vst.msk [vmem:[#allocation2 + $0x30] sm:$0xff] %vm246_vm0, %v4435_v0  ;;  %255 = vst.msk [vmem:[#allocation2 + $0x38] sm:$0xff] %vm246_vm0, %v4435_v0  ;;  %s2740_s19 = sshll.u32 %s4606_s15, 6  ;;  %v326_v41 = vunpack.c.l.s4 %v2815_v40  ;;  %v2951_v48 = vshrl.u32 %v328_v42, 7  ;;  %s2818_s27 = smov 64   ;;  %vm515_vm5 = vcmask 130048  }
  0x10   : > { %257 = vst.msk [vmem:[#allocation2 + $0x48] sm:$0xff] %vm246_vm0, %v4435_v0  ;;  %258 = vst.msk [vmem:[#allocation2 + $0x50] sm:$0xff] %vm246_vm0, %v4435_v0  ;;  %s223_s22 = scalar_lea.vmem %s4426_s0, %s2740_s19  ;;  %s2819_s28 = smov 16   ;;  %vm517_vm6 = vcmask 261120   ;;  %vm519_vm7 = vcmask 392192   ;;  %vm521_vm8 = vcmask 523264  }
  0x11   : > { %253 = vst.msk [vmem:[#allocation2 + $0x28] sm:$0x3] %vm249_vm1, %v4435_v0  ;;  %250 = vst.msk [vmem:[#allocation2 + $0x10] sm:$0x3] %vm249_vm1, %v4435_v0  ;;  %v262_v1 = vld [vmem:[%s223_s22 + $0x10] sm:$0xff]  ;;  %v260_v2 = vld [vmem:[%s223_s22] sm:$0xff]  ;;  %v327_v47 = vunpack.c.0.s8 %v326_v41 }
  0x12   : > { %256 = vst.msk [vmem:[#allocation2 + $0x40] sm:$0x3] %vm249_vm1, %v4435_v0  ;;  %259 = vst.msk [vmem:[#allocation2 + $0x58] sm:$0x3] %vm249_vm1, %v4435_v0  ;;  %280 = vrot.lane.b32.xlu1 %v262_v1, %s2812_s23  ;;  %276 = vrot.lane.b32.xlu0 %v260_v2, %s2812_s23  ;;  %v263_v3 = vld [vmem:[%s223_s22 + $0x18] sm:$0xff]  ;;  %v261_v4 = vld [vmem:[%s223_s22 + $0x8] sm:$0xff] }
  0x13   : > { %v265_v5 = vld [vmem:[%s223_s22 + $0x28] sm:$0xff]  ;;  %v264_v6 = vld [vmem:[%s223_s22 + $0x20] sm:$0xff]  ;;  %v267_v7 = vld [vmem:[%s223_s22 + $0x38] sm:$0xff]  ;;  %v2970_v60 = vsub.s32 %v327_v47, %v2951_v48  ;;  %s2820_s29 = smov 48   ;;  %s2821_s30 = smov 80   ;;  %vm523_vm9 = vcmask 654336  }
  0x14   : > { %v266_v8 = vld [vmem:[%s223_s22 + $0x30] sm:$0xff]  ;;  %s2822_s5 = smov 96   ;;  %s2823_s6 = smov 112   ;;  %vm525_vm10 = vcmask 785408   ;;  %vm527_vm11 = vcmask 916480   ;;  %vm2455_vm12 = vcmask 1043456  }
  0x15   : > { %vm2451_vm13 = vcmask 293888   ;;  %s2741_s9 = sshll.u32 %s4606_s15, 4  ;;  %s2733_s13 = sshll.u32 %s4606_s15, 3  ;;  %vm2549_vm14 = vcmask 7168  }
  0x16   : > { %282 = vrot.lane.b32.xlu1 %v263_v3, %s2812_s23  ;;  %278 = vrot.lane.b32.xlu0 %v261_v4, %s2812_s23  ;;  %s232_s12 = scalar_lea.vmem %s4428_s2, %s2741_s9  ;;  %s237_s20 = scalar_lea.vmem %s4429_s3, %s2733_s13 }
  0x1a   : > { %286 = vrot.lane.b32.xlu1 %v265_v5, %s2812_s23  ;;  %284 = vrot.lane.b32.xlu0 %v264_v6, %s2812_s23 }
  0x1e   : > { %290 = vrot.lane.b32.xlu1 %v267_v7, %s2812_s23  ;;  %288 = vrot.lane.b32.xlu0 %v266_v8, %s2812_s23  ;;  %s241_s23 = scalar_lea.vmem %s4430_s4, %s2733_s13 }
  0x84   : > { %v281_v9 = vpop.permute.xlu1 %280  ;;  %v277_v10 = vpop.permute.xlu0 %276 }
  0x85   : > { %303 = vst.msk [vmem:[#allocation2 + $0x19] sm:$0xff] %vm300_vm2, %v281_v9  ;;  %301 = vst.msk [vmem:[#allocation2 + $0x1] sm:$0xff] %vm300_vm2, %v277_v10 }
  0x88   : > { %v283_v11 = vpop.permute.xlu1 %282  ;;  %v279_v12 = vpop.permute.xlu0 %278 }
  0x89   : > { %304 = vst.msk [vmem:[#allocation2 + $0x21] sm:$0xff] %vm300_vm2, %v283_v11  ;;  %302 = vst.msk [vmem:[#allocation2 + $0x9] sm:$0xff] %vm300_vm2, %v279_v12 }
  0x8c   : > { %v287_v13 = vpop.permute.xlu1 %286  ;;  %v285_v14 = vpop.permute.xlu0 %284  ;;  %v2913_v25 = vld [vmem:[#allocation2] sm:$0xff]  ;;  %v2957_v51 = vld [vmem:[#allocation2 + $0x18] sm:$0xff] }
  0x8d   : > { %306 = vst.msk [vmem:[#allocation2 + $0x39] sm:$0xff] %vm300_vm2, %v287_v13  ;;  %305 = vst.msk [vmem:[#allocation2 + $0x31] sm:$0xff] %vm300_vm2, %v285_v14  ;;  %v1739_v61 = vrot.slane %v2957_v51, 2  ;;  %v1734_v5 = vrot.slane %v2913_v25, 2 }
  0x90   : > { %v291_v15 = vpop.permute.xlu1 %290  ;;  %v289_v16 = vpop.permute.xlu0 %288  ;;  %v2893_v17 = vld [vmem:[#allocation2 + $0x20] sm:$0xff]  ;;  %v2895_v18 = vld [vmem:[#allocation2 + $0x8] sm:$0xff]  ;;  %v2897_v19 = vld [vmem:[#allocation2 + $0x10] sm:$0x3] }
  0x91   : > { %308 = vst.msk [vmem:[#allocation2 + $0x51] sm:$0xff] %vm300_vm2, %v291_v15  ;;  %307 = vst.msk [vmem:[#allocation2 + $0x49] sm:$0xff] %vm300_vm2, %v289_v16  ;;  %552 = vrot.lane.b32.xlu1 %v2893_v17, %s2813_s24  ;;  %548 = vrot.lane.b32.xlu0 %v2895_v18, %s2813_s24  ;;  %v1735_v20 = vrot.slane %v2895_v18, 2  ;;  %v1737_v21 = vrot.slane %v2897_v19, 2  ;;  %v316_v32 = vld [vmem:[#allocation2 + $0x28] sm:$0x3] }
  0x92   : > { %v1740_v43 = vrot.slane %v2893_v17, 2  ;;  %v1742_v44 = vrot.slane %v316_v32, 2  ;;  %v1027_v56 = vrot.slane %v2893_v17, 1  ;;  %v1029_v57 = vrot.slane %v316_v32, 1 }
  0x93   : > { %v2923_v30 = vsel %vm1733_vm3, %v1735_v20, %v1737_v21  ;;  %v1022_v63 = vrot.slane %v2895_v18, 1  ;;  %v1024_v1 = vrot.slane %v2897_v19, 1  ;;  %v3017_v12 = vsel %vm1733_vm3, %v1734_v5, %v1735_v20 }
  0x94   : > { %v2907_v22 = vld [vmem:[#allocation2 + $0x38] sm:$0xff]  ;;  %v2909_v23 = vld [vmem:[#allocation2 + $0x30] sm:$0xff]  ;;  %v319_v24 = vld [vmem:[#allocation2 + $0x40] sm:$0x3]  ;;  %v2954_v49 = vsel %vm1733_vm3, %v1740_v43, %v1742_v44  ;;  %v2994_v7 = vsel %vm1733_vm3, %v1739_v61, %v1740_v43  ;;  %v2999_v8 = vsel %vm1020_vm4, %v1027_v56, %v1029_v57 }
  0x95   : > { %556 = vrot.lane.b32.xlu0 %v2907_v22, %s2813_s24  ;;  %v1745_v26 = vrot.slane %v2907_v22, 2  ;;  %v1747_v27 = vrot.slane %v319_v24, 2  ;;  %v391_v28 = vcombine.low %v2895_v18, %v2907_v22  ;;  %v323_v29 = vcombine.low %v2913_v25, %v2909_v23 }
  0x96   : > { %v392_v33 = vcombine.high %v2895_v18, %v2907_v22  ;;  %v324_v34 = vcombine.high %v2913_v25, %v2909_v23  ;;  %v1744_v55 = vrot.slane %v2909_v23, 2  ;;  %v1032_v58 = vrot.slane %v2907_v22, 1 }
  0x97   : > { %v2926_v31 = vsel %vm1733_vm3, %v1745_v26, %v1747_v27  ;;  %v1034_v59 = vrot.slane %v319_v24, 1  ;;  %v3026_v15 = vsel %vm1020_vm4, %v1022_v63, %v1024_v1  ;;  %v3075_v41 = vrot.slane %v323_v29, %v2970_v60 }
  0x98   : > { %v2932_v35 = vld [vmem:[#allocation2 + $0x50] sm:$0xff]  ;;  %v1831_v36 = vcombine.high %v2923_v30, %v2926_v31  ;;  %v322_v37 = vld [vmem:[#allocation2 + $0x58] sm:$0x3]  ;;  %v2942_v45 = vld [vmem:[#allocation2 + $0x48] sm:$0xff]  ;;  %v2991_v6 = vsel %vm1733_vm3, %v1744_v55, %v1745_v26  ;;  %v3100_v47 = vrot.slane %v392_v33, %v2970_v60  ;;  %v3113_v55 = vrot.slane %v324_v34, %v2970_v60 }
  0x99   : > { %786 = vrot.lane.b32.xlu0 %v2895_v18, %s2814_s25  ;;  %560 = vrot.lane.b32.xlu1 %v2932_v35, %s2813_s24  ;;  %v1750_v38 = vrot.slane %v2932_v35, 2  ;;  %v1752_v39 = vrot.slane %v322_v37, 2  ;;  %v1749_v50 = vrot.slane %v2942_v45, 2  ;;  %v1037_v53 = vrot.slane %v2932_v35, 1 }
  0x9a   : > { %v1039_v54 = vrot.slane %v322_v37, 1  ;;  %v2984_v3 = vrot.slane %v1831_v36, %v2970_v60  ;;  %v3010_v10 = vsel %vm1020_vm4, %v1032_v58, %v1034_v59  ;;  %v1763_v14 = vcombine.high %v3017_v12, %v2991_v6  ;;  %4481 = vst [vmem:[#allocation9_spill] sm:$0xff] %v3100_v47  ;;  %4483 = vst [vmem:[#allocation11_spill] sm:$0xff] %v3113_v55 }
  0x9b   : > { %v2945_v46 = vsel %vm1733_vm3, %v1750_v38, %v1752_v39  ;;  %v2974_v62 = vsel %vm1733_vm3, %v1749_v50, %v1750_v38  ;;  %v1118_v16 = vcombine.high %v3026_v15, %v3010_v10  ;;  %v407_v27 = vcombine.low %v2893_v17, %v2932_v35 }
  0x9c   : > { %v1847_v52 = vcombine.high %v2954_v49, %v2945_v46  ;;  %v2981_v2 = vsel %vm1020_vm4, %v1037_v53, %v1039_v54  ;;  %v1779_v9 = vcombine.high %v2994_v7, %v2974_v62  ;;  %v3041_v21 = vrot.slane %v1763_v14, %v2970_v60 }
  0x9d   : > { %794 = vrot.lane.b32.xlu0 %v2907_v22, %s2814_s25  ;;  %790 = vrot.lane.b32.xlu1 %v2893_v17, %s2814_s25  ;;  %v1134_v13 = vcombine.high %v2999_v8, %v2981_v2  ;;  %v3044_v24 = vrot.slane %v1118_v16, %v2970_v60  ;;  %v3060_v36 = vrot.slane %v391_v28, %v2970_v60  ;;  %v1021_v34 = vrot.slane %v2913_v25, 1 }
  0x9e   : > { %v2987_v4 = vrot.slane %v1847_v52, %v2970_v60  ;;  %v3035_v19 = vrot.slane %v1779_v9, %v2970_v60  ;;  %v3063_v37 = vrot.slane %v407_v27, %v2970_v60  ;;  %v339_v38 = vcombine.low %v2957_v51, %v2942_v45 }
  0x9f   : > { %v3038_v20 = vrot.slane %v1134_v13, %v2970_v60  ;;  %4477 = vst [vmem:[#allocation5_spill] sm:$0xff] %v3044_v24  ;;  %4478 = vst [vmem:[#allocation6_spill] sm:$0xff] %v3060_v36  ;;  %v408_v29 = vcombine.high %v2893_v17, %v2932_v35  ;;  %v340_v52 = vcombine.high %v2957_v51, %v2942_v45  ;;  %v1031_v5 = vrot.slane %v2909_v23, 1 }
  0xa0   : > { %v1878_v11 = vcombine.low %v2984_v3, %v2987_v4  ;;  %v1879_v26 = vcombine.high %v2984_v3, %v2987_v4  ;;  %4479 = vst [vmem:[#allocation7_spill] sm:$0xff] %v3063_v37  ;;  %v423_v40 = vcombine.low %v3060_v36, %v3063_v37  ;;  %v3078_v28 = vrot.slane %v339_v38, %v2970_v60 }
  0xa1   : > { %546 = vrot.lane.b32.xlu0 %v2913_v25, %s2813_s24  ;;  %798 = vrot.lane.b32.xlu1 %v2932_v35, %s2814_s25  ;;  %4476 = vst [vmem:[#allocation4_spill] sm:$0xff] %v3038_v20  ;;  %v3103_v50 = vrot.slane %v408_v29, %v2970_v60  ;;  %v3116_v57 = vrot.slane %v340_v52, %v2970_v60  ;;  %v1026_v9 = vrot.slane %v2957_v51, 1  ;;  %v2816_v35 = vmov 1934713408  }
  0xa2   : > { %4480 = vst [vmem:[#allocation8_spill] sm:$0xff] %v3078_v28  ;;  %v3160_v1 = vsel %vm1020_vm4, %v1021_v34, %v1022_v63  ;;  %v3171_v13 = vsel %vm1020_vm4, %v1031_v5, %v1032_v58  ;;  %v1778_v17 = vcombine.low %v2994_v7, %v2974_v62  ;;  %v1830_v58 = vcombine.low %v2923_v30, %v2926_v31 }
  0xa3   : > { %4482 = vst [vmem:[#allocation10_spill] sm:$0xff] %v3103_v50  ;;  %4484 = vst [vmem:[#allocation12_spill] sm:$0xff] %v3116_v57  ;;  %v3176_v18 = vsel %vm1020_vm4, %v1026_v9, %v1027_v56  ;;  %v1810_v52 = vcombine.low %v3041_v21, %v3035_v19 }
  0xa4   : > { %v1786_v56 = vrot.slane %v1778_v17, %v2970_v60 }
  0xa5   : > { %554 = vrot.lane.b32.xlu0 %v2909_v23, %s2813_s24  ;;  %550 = vrot.lane.b32.xlu1 %v2957_v51, %s2813_s24 }
  0xa9   : > { %784 = vrot.lane.b32.xlu0 %v2913_v25, %s2814_s25  ;;  %558 = vrot.lane.b32.xlu1 %v2942_v45, %s2813_s24  ;;  %v1762_v25 = vcombine.low %v3017_v12, %v2991_v6 }
  0xad   : > { %792 = vrot.lane.b32.xlu0 %v2909_v23, %s2814_s25  ;;  %788 = vrot.lane.b32.xlu1 %v2957_v51, %s2814_s25  ;;  %v1036_v23 = vrot.slane %v2942_v45, 1  ;;  %v1846_v51 = vcombine.low %v2954_v49, %v2945_v46 }
  0xaf   : > { %v3186_v22 = vsel %vm1020_vm4, %v1036_v23, %v1037_v53 }
  0xb0   : > { %v1065_v53 = vcombine.low %v3176_v18, %v3186_v22 }
  0xb1   : > { %1972 = vrot.lane.b32.xlu0 %v2923_v30, %s2813_s24  ;;  %796 = vrot.lane.b32.xlu1 %v2942_v45, %s2814_s25  ;;  %v358_v45 = vunpack.c.l.s4 %v2816_v35 }
  0xb3   : > { %v359_v63 = vunpack.c.0.s8 %v358_v45 }
  0xb5   : > { %1980 = vrot.lane.b32.xlu0 %v2926_v31, %s2813_s24  ;;  %1976 = vrot.lane.b32.xlu1 %v2954_v49, %s2813_s24  ;;  %v3226_v14 = vsub.s32 %v359_v63, %v2951_v48 }
  0xb7   : > { %v1818_v9 = vrot.slane %v1810_v52, %v3226_v14 }
  0xb9   : > { %2210 = vrot.lane.b32.xlu0 %v2923_v30, %s2814_s25  ;;  %1984 = vrot.lane.b32.xlu1 %v2945_v46, %s2813_s24  ;;  %v1073_v30 = vrot.slane %v1065_v53, %v2970_v60 }
  0xbd   : > { %2218 = vrot.lane.b32.xlu0 %v2926_v31, %s2814_s25  ;;  %2214 = vrot.lane.b32.xlu1 %v2954_v49, %s2814_s25  ;;  %v1854_v49 = vrot.slane %v1846_v51, %v2970_v60  ;;  %v1838_v31 = vrot.slane %v1830_v58, %v2970_v60  ;;  %v1165_v51 = vcombine.low %v3044_v24, %v3038_v20 }
  0xbf   : > { %v1862_v35 = vcombine.low %v1838_v31, %v1854_v49  ;;  %v3262_v58 = vrot.slane %v1165_v51, %v3226_v14 }
  0xc1   : > { %1970 = vrot.lane.b32.xlu0 %v3017_v12, %s2813_s24  ;;  %2222 = vrot.lane.b32.xlu1 %v2945_v46, %s2814_s25  ;;  %v1770_v46 = vrot.slane %v1762_v25, %v2970_v60  ;;  %v1886_v25 = vrot.slane %v1878_v11, %v3226_v14 }
  0xc3   : > { %v1794_v34 = vcombine.low %v1770_v46, %v1786_v56 }
  0xc5   : > { %1978 = vrot.lane.b32.xlu0 %v2991_v6, %s2813_s24  ;;  %1974 = vrot.lane.b32.xlu1 %v2994_v7, %s2813_s24  ;;  %v3244_v23 = vrot.slane %v1794_v34, %v3226_v14 }
  0xc7   : > { %4485 = vst [vmem:[#allocation13_spill] sm:$0xff] %v3244_v23  ;;  %v1826_v45 = vcombine.high %v3244_v23, %v4435_v0 }
  0xc9   : > { %2208 = vrot.lane.b32.xlu0 %v3017_v12, %s2814_s25  ;;  %1982 = vrot.lane.b32.xlu1 %v2974_v62, %s2813_s24  ;;  %v1117_v12 = vcombine.low %v3026_v15, %v3010_v10 }
  0xcd   : > { %2216 = vrot.lane.b32.xlu0 %v2991_v6, %s2814_s25  ;;  %2212 = vrot.lane.b32.xlu1 %v2994_v7, %s2814_s25  ;;  %v1133_v6 = vcombine.low %v2999_v8, %v2981_v2  ;;  %v1795_v7 = vcombine.high %v1770_v46, %v1786_v56 }
  0xcf   : > { %v1141_v38 = vrot.slane %v1133_v6, %v2970_v60 }
  0xd1   : > { %1497 = vrot.lane.b32.xlu0 %v3026_v15, %s2814_s25  ;;  %2220 = vrot.lane.b32.xlu1 %v2974_v62, %s2814_s25  ;;  %v1049_v62 = vcombine.low %v3160_v1, %v3171_v13 }
  0xd3   : > { %v1057_v16 = vrot.slane %v1049_v62, %v2970_v60  ;;  %v3267_v62 = vrot.slane %v1862_v35, %v3226_v14 }
  0xd5   : > { %1505 = vrot.lane.b32.xlu0 %v3010_v10, %s2814_s25  ;;  %1501 = vrot.lane.b32.xlu1 %v2999_v8, %s2814_s25  ;;  %v1082_v27 = vcombine.high %v1057_v16, %v1073_v30  ;;  %v1081_v56 = vcombine.low %v1057_v16, %v1073_v30  ;;  %4487 = vst [vmem:[#allocation15_spill] sm:$0xff] %v3267_v62 }
  0xd7   : > { %v1096_v48 = vrot.slane %v1082_v27, %v3226_v14  ;;  %v3270_v63 = vrot.slane %v1081_v56, %v3226_v14 }
  0xd9   : > { %1495 = vrot.lane.b32.xlu0 %v3160_v1, %s2814_s25  ;;  %1509 = vrot.lane.b32.xlu1 %v2981_v2, %s2814_s25  ;;  %4488 = vst [vmem:[#allocation16_spill] sm:$0xff] %v3270_v63  ;;  %v1113_v6 = vcombine.high %v3270_v63, %v4435_v0 }
  0xdd   : > { %1503 = vrot.lane.b32.xlu0 %v3171_v13, %s2814_s25  ;;  %1499 = vrot.lane.b32.xlu1 %v3176_v18, %s2814_s25 }
  0xe1   : > { %1265 = vrot.lane.b32.xlu0 %v3026_v15, %s2813_s24  ;;  %1507 = vrot.lane.b32.xlu1 %v3186_v22, %s2814_s25 }
  0xe5   : > { %1273 = vrot.lane.b32.xlu0 %v3010_v10, %s2813_s24  ;;  %1269 = vrot.lane.b32.xlu1 %v2999_v8, %s2813_s24  ;;  %v1809_v8 = vrot.slane %v1795_v7, %v3226_v14  ;;  %v1125_v10 = vrot.slane %v1117_v12, %v2970_v60 }
  0xe7   : > { %v1150_v29 = vcombine.high %v1125_v10, %v1141_v38  ;;  %v1149_v17 = vcombine.low %v1125_v10, %v1141_v38  ;;  %v1827_v12 = vcombine.high %v1809_v8, %v4435_v0  ;;  %v1114_v10 = vcombine.high %v1096_v48, %v4435_v0 }
  0xe9   : > { %1263 = vrot.lane.b32.xlu0 %v3160_v1, %s2813_s24  ;;  %1277 = vrot.lane.b32.xlu1 %v2981_v2, %s2813_s24  ;;  %v1863_v2 = vcombine.high %v1838_v31, %v1854_v49  ;;  %v1164_v5 = vrot.slane %v1150_v29, %v3226_v14  ;;  %v3257_v53 = vrot.slane %v1149_v17, %v3226_v14 }
  0xea   : > { %v1894_v49 = vcombine.high %v3267_v62, %v4435_v0  ;;  %v1896_v17 = vcombine.high %v1886_v25, %v4435_v0 }
  0xeb   : > { %v1877_v15 = vrot.slane %v1863_v2, %v3226_v14  ;;  %4486 = vst [vmem:[#allocation14_spill] sm:$0xff] %v3257_v53  ;;  %v1181_v11 = vcombine.high %v3257_v53, %v4435_v0  ;;  %v1182_v38 = vcombine.high %v1164_v5, %v4435_v0 }
  0xed   : > { %1271 = vrot.lane.b32.xlu0 %v3171_v13, %s2813_s24  ;;  %1267 = vrot.lane.b32.xlu1 %v3176_v18, %s2813_s24  ;;  %v1895_v31 = vcombine.high %v1877_v15, %v4435_v0 }
  0xf1   : > { %1903 = vrot.lane.b32.xlu0 %v1809_v8, %s2817_s26  ;;  %1275 = vrot.lane.b32.xlu1 %v3186_v22, %s2813_s24 }
  0xf5   : > { %1931 = vrot.lane.b32.xlu1 %v1877_v15, %s2817_s26  ;;  %1190 = vrot.lane.b32.xlu0 %v1096_v48, %s2817_s26  ;;  %v3315_v48 = vrot.slane %v423_v40, %v3226_v14 }
  0xf7   : > { %4496 = vst [vmem:[#allocation24_spill] sm:$0xff] %v3315_v48  ;;  %v455_v40 = vcombine.high %v3315_v48, %v4435_v0 }
  0xf9   : > { %1218 = vrot.lane.b32.xlu1 %v1164_v5, %s2817_s26  ;;  %1911 = vrot.lane.b32.xlu0 %v1818_v9, %s2818_s27  ;;  %v1828_v5 = vcombine.high %v1818_v9, %v4435_v0 }
  0xfd   : > { %1939 = vrot.lane.b32.xlu1 %v1886_v25, %s2818_s27  ;;  %1899 = vrot.lane.b32.xlu0 %v1826_v45, %s2819_s28  ;;  %v3323_v45 = vrot.slane %v1879_v26, %v3226_v14 }
  0xff   : > { %4497 = vst [vmem:[#allocation25_spill] sm:$0xff] %v3323_v45 }
 0x101   : > { %1226 = vrot.lane.b32.xlu1 %v3262_v58, %s2818_s27  ;;  %1214 = vrot.lane.b32.xlu0 %v1181_v11, %s2819_s28 }
 0x103   : > { %v3275_v46 = vpop.permute.xlu0 %548  ;;  %v3283_v7 = vpop.permute.xlu1 %552 }
 0x104   : > { %4489 = vst [vmem:[#allocation17_spill] sm:$0xff] %v3275_v46  ;;  %4490 = vst [vmem:[#allocation18_spill] sm:$0xff] %v3283_v7 }
 0x105   : > { %1927 = vrot.lane.b32.xlu1 %v1894_v49, %s2819_s28  ;;  %1186 = vrot.lane.b32.xlu0 %v1113_v6, %s2819_s28 }
 0x107   : > { %v3285_v30 = vpop.permute.xlu0 %556 }
 0x108   : > { %4491 = vst [vmem:[#allocation19_spill] sm:$0xff] %v3285_v30  ;;  %v638_v16 = vcombine.low %v3275_v46, %v3285_v30 }
 0x109   : > { %1935 = vrot.lane.b32.xlu1 %v1895_v31, %s2820_s29  ;;  %1907 = vrot.lane.b32.xlu0 %v1827_v12, %s2820_s29 }
 0x10a   : > { %v646_v8 = vrot.slane %v638_v16, %v2970_v60 }
 0x10b   : > { %v3293_v2 = vpop.permute.xlu1 %560  ;;  %v3295_v27 = vpop.permute.xlu0 %786 }
 0x10c   : > { %4492 = vst [vmem:[#allocation20_spill] sm:$0xff] %v3293_v2  ;;  %4493 = vst [vmem:[#allocation21_spill] sm:$0xff] %v3295_v27  ;;  %v654_v15 = vcombine.low %v3283_v7, %v3293_v2 }
 0x10d   : > { %1222 = vrot.lane.b32.xlu1 %v1182_v38, %s2820_s29  ;;  %1194 = vrot.lane.b32.xlu0 %v1114_v10, %s2820_s29 }
 0x10e   : > { %v662_v29 = vrot.slane %v654_v15, %v2970_v60 }
 0x10f   : > { %v3305_v52 = vpop.permute.xlu1 %790  ;;  %v3307_v34 = vpop.permute.xlu0 %794 }
 0x110   : > { %4494 = vst [vmem:[#allocation22_spill] sm:$0xff] %v3305_v52  ;;  %4495 = vst [vmem:[#allocation23_spill] sm:$0xff] %v3307_v34  ;;  %v670_v35 = vcombine.low %v646_v8, %v662_v29  ;;  %v876_v9 = vcombine.low %v3295_v27, %v3307_v34  ;;  %v671_v56 = vcombine.high %v646_v8, %v662_v29 }
 0x111   : > { %1943 = vrot.lane.b32.xlu1 %v1896_v17, %s2821_s30  ;;  %1915 = vrot.lane.b32.xlu0 %v1828_v5, %s2821_s30 }
 0x112   : > { %v3334_v11 = vrot.slane %v670_v35, %v3226_v14  ;;  %v884_v4 = vrot.slane %v876_v9, %v2970_v60  ;;  %v685_v31 = vrot.slane %v671_v56, %v3226_v14 }
 0x113   : > { %v3327_v25 = vpop.permute.xlu1 %798  ;;  %v3329_v51 = vpop.permute.xlu0 %546 }
 0x114   : > { %4498 = vst [vmem:[#allocation26_spill] sm:$0xff] %v3327_v25  ;;  %4499 = vst [vmem:[#allocation27_spill] sm:$0xff] %v3329_v51  ;;  %v892_v49 = vcombine.low %v3305_v52, %v3327_v25  ;;  %v702_v12 = vcombine.high %v3334_v11, %v4435_v0  ;;  %v703_v48 = vcombine.high %v685_v31, %v4435_v0 }
 0x115   : > { %4500 = vst [vmem:[#allocation28_spill] sm:$0xff] %v3334_v11  ;;  %1947 = vrot.lane.b32.xlu1 %v3323_v45, %s2822_s5  ;;  %488 = vrot.lane.b32.xlu0 %v455_v40, %s2819_s28 }
 0x116   : > { %v900_v3 = vrot.slane %v892_v49, %v2970_v60 }
 0x117   : > { %v3343_v26 = vpop.permute.xlu1 %550  ;;  %v3345_v6 = vpop.permute.xlu0 %554 }
 0x118   : > { %4501 = vst [vmem:[#allocation29_spill] sm:$0xff] %v3343_v26  ;;  %4502 = vst [vmem:[#allocation30_spill] sm:$0xff] %v3345_v6  ;;  %v909_v16 = vcombine.high %v884_v4, %v900_v3  ;;  %v570_v38 = vcombine.low %v3329_v51, %v3345_v6 }
 0x119   : > { %739 = vrot.lane.b32.xlu1 %v685_v31, %s2817_s26  ;;  %735 = vrot.lane.b32.xlu0 %v702_v12, %s2819_s28 }
 0x11a   : > { %v3359_v8 = vrot.slane %v909_v16, %v3226_v14  ;;  %v578_v17 = vrot.slane %v570_v38, %v2970_v60 }
 0x11b   : > { %v3354_v10 = vpop.permute.xlu1 %558  ;;  %v3356_v15 = vpop.permute.xlu0 %784 }
 0x11c   : > { %4503 = vst [vmem:[#allocation31_spill] sm:$0xff] %v3354_v10  ;;  %4504 = vst [vmem:[#allocation32_spill] sm:$0xff] %v3356_v15  ;;  %v586_v29 = vcombine.low %v3343_v26, %v3354_v10 }
 0x11d   : > { %977 = vrot.lane.b32.xlu1 %v3359_v8, %s2817_s26 }
 0x11e   : > { %v594_v5 = vrot.slane %v586_v29, %v2970_v60 }
 0x11f   : > { %v3367_v35 = vpop.permute.xlu1 %788  ;;  %v3369_v9 = vpop.permute.xlu0 %792 }
 0x120   : > { %4505 = vst [vmem:[#allocation33_spill] sm:$0xff] %v3367_v35  ;;  %4506 = vst [vmem:[#allocation34_spill] sm:$0xff] %v3369_v9  ;;  %v602_v40 = vcombine.low %v578_v17, %v594_v5  ;;  %v603_v56 = vcombine.high %v578_v17, %v594_v5  ;;  %v808_v49 = vcombine.low %v3356_v15, %v3369_v9 }
 0x122   : > { %v3374_v12 = vrot.slane %v602_v40, %v3226_v14  ;;  %v3381_v38 = vrot.slane %v603_v56, %v3226_v14  ;;  %v816_v17 = vrot.slane %v808_v49, %v2970_v60  ;;  %v908_v40 = vcombine.low %v884_v4, %v900_v3 }
 0x123   : > { %v3376_v16 = vpop.permute.xlu1 %796  ;;  %v3378_v33 = vpop.permute.xlu0 %1972 }
 0x124   : > { %4507 = vst [vmem:[#allocation35_spill] sm:$0xff] %v3374_v12  ;;  %4508 = vst [vmem:[#allocation36_spill] sm:$0xff] %v3376_v16  ;;  %v824_v29 = vcombine.low %v3367_v35, %v3376_v16  ;;  %v634_v61 = vcombine.high %v3374_v12, %v4435_v0  ;;  %711 = vrot.lane.b32.xlu1 %v3381_v38, %s2817_s26 }
 0x125   : > { %4509 = vst [vmem:[#allocation37_spill] sm:$0xff] %v3381_v38 }
 0x126   : > { %v832_v5 = vrot.slane %v824_v29, %v2970_v60  ;;  %707 = vrot.lane.b32.xlu0 %v634_v61, %s2819_s28  ;;  %v3407_v61 = vrot.slane %v908_v40, %v3226_v14 }
 0x127   : > { %v3392_v59 = vpop.permute.xlu1 %1976  ;;  %v3394_v56 = vpop.permute.xlu0 %1980 }
 0x128   : > { %v840_v54 = vcombine.low %v816_v17, %v832_v5  ;;  %v841_v44 = vcombine.high %v816_v17, %v832_v5  ;;  %v2062_v39 = vcombine.low %v3378_v33, %v3394_v56  ;;  %4512 = vst [vmem:[#allocation40_spill] sm:$0xff] %v3407_v61  ;;  %v940_v5 = vcombine.high %v3407_v61, %v4435_v0 }
 0x129   : > { %v2063_v26 = vcombine.high %v3378_v33, %v3394_v56 }
 0x12a   : > { %v3399_v42 = vrot.slane %v840_v54, %v3226_v14  ;;  %v3404_v49 = vrot.slane %v841_v44, %v3226_v14  ;;  %v3415_v54 = vrot.slane %v2062_v39, %v2970_v60 }
 0x12b   : > { %v1985_v43 = vpop.permute.xlu1 %1984  ;;  %v3401_v32 = vpop.permute.xlu0 %2210  ;;  %v3513_v34 = vrot.slane %v2063_v26, %v2970_v60 }
 0x12c   : > { %4510 = vst [vmem:[#allocation38_spill] sm:$0xff] %v3399_v42  ;;  %4511 = vst [vmem:[#allocation39_spill] sm:$0xff] %v3404_v49  ;;  %v2078_v3 = vcombine.low %v3392_v59, %v1985_v43  ;;  %v872_v4 = vcombine.high %v3399_v42, %v4435_v0  ;;  %949 = vrot.lane.b32.xlu1 %v3404_v49, %s2817_s26 }
 0x12e   : > { %v3418_v29 = vrot.slane %v2078_v3, %v2970_v60  ;;  %945 = vrot.lane.b32.xlu0 %v872_v4, %s2819_s28 }
 0x12f   : > { %v2215_v44 = vpop.permute.xlu1 %2214  ;;  %v2219_v17 = vpop.permute.xlu0 %2218 }
 0x130   : > { %973 = vrot.lane.b32.xlu1 %v940_v5, %s2819_s28  ;;  %v2095_v39 = vcombine.high %v3415_v54, %v3418_v29  ;;  %v2300_v3 = vcombine.low %v3401_v32, %v2219_v17 }
 0x132   : > { %743 = vrot.lane.b32.xlu0 %v703_v48, %s2820_s29  ;;  %v3434_v12 = vrot.slane %v2095_v39, %v3226_v14  ;;  %v3442_v5 = vrot.slane %v2300_v3, %v2970_v60 }
 0x133   : > { %v2223_v4 = vpop.permute.xlu1 %2222  ;;  %v3431_v42 = vpop.permute.xlu0 %1970 }
 0x134   : > { %v2316_v61 = vcombine.low %v2215_v44, %v2223_v4  ;;  %2163 = vrot.lane.b32.xlu1 %v3434_v12, %s2817_s26  ;;  %v2317_v10 = vcombine.high %v2215_v44, %v2223_v4 }
 0x136   : > { %v3439_v31 = vrot.slane %v2316_v61, %v2970_v60  ;;  %v3516_v33 = vrot.slane %v2317_v10, %v2970_v60 }
 0x137   : > { %v1975_v0 = vpop.permute.xlu1 %1974  ;;  %v3444_v48 = vpop.permute.xlu0 %1978 }
 0x138   : > { %v2333_v40 = vcombine.high %v3442_v5, %v3439_v31  ;;  %v1994_v39 = vcombine.low %v3431_v42, %v3444_v48  ;;  %v1995_v10 = vcombine.high %v3431_v42, %v3444_v48 }
 0x13a   : > { %v3453_v53 = vrot.slane %v2333_v40, %v3226_v14  ;;  %v3461_v23 = vrot.slane %v1994_v39, %v2970_v60 }
 0x13b   : > { %v1983_v11 = vpop.permute.xlu1 %1982  ;;  %v3450_v63 = vpop.permute.xlu0 %2208 }
 0x13c   : > { %v2010_v61 = vcombine.low %v1975_v0, %v1983_v11  ;;  %2401 = vrot.lane.b32.xlu1 %v3453_v53, %s2817_s26  ;;  %v2011_v44 = vcombine.high %v1975_v0, %v1983_v11 }
 0x13e   : > { %v3458_v3 = vrot.slane %v2010_v61, %v2970_v60 }
 0x13f   : > { %v3463_v62 = vpop.permute.xlu1 %2212  ;;  %v3465_v57 = vpop.permute.xlu0 %2216 }
 0x140   : > { %v2027_v55 = vcombine.high %v3461_v23, %v3458_v3  ;;  %v2232_v40 = vcombine.low %v3450_v63, %v3465_v57 }
 0x142   : > { %v3474_v20 = vrot.slane %v2027_v55, %v3226_v14  ;;  %v3483_v24 = vrot.slane %v2232_v40, %v2970_v60  ;;  %v2079_v55 = vcombine.high %v3392_v59, %v1985_v43  ;;  %v2301_v59 = vcombine.high %v3401_v32, %v2219_v17 }
 0x143   : > { %v2221_v50 = vpop.permute.xlu1 %2220  ;;  %v3471_v47 = vpop.permute.xlu0 %1497 }
 0x144   : > { %v2248_v61 = vcombine.low %v3463_v62, %v2221_v50  ;;  %2135 = vrot.lane.b32.xlu0 %v3474_v20, %s2817_s26  ;;  %v3506_v43 = vrot.slane %v2079_v55, %v2970_v60  ;;  %v3521_v55 = vrot.slane %v2301_v59, %v2970_v60 }
 0x146   : > { %v3480_v39 = vrot.slane %v2248_v61, %v2970_v60  ;;  %v2110_v26 = vcombine.low %v3513_v34, %v3506_v43  ;;  %v2348_v0 = vcombine.low %v3521_v55, %v3516_v33 }
 0x147   : > { %v3485_v15 = vpop.permute.xlu1 %1501  ;;  %v3487_v9 = vpop.permute.xlu0 %1505 }
 0x148   : > { %v2265_v35 = vcombine.high %v3483_v24, %v3480_v39  ;;  %v1587_v16 = vcombine.low %v3471_v47, %v3487_v9 }
 0x14a   : > { %v3495_v61 = vrot.slane %v2265_v35, %v3226_v14  ;;  %v3510_v35 = vrot.slane %v1587_v16, %v2970_v60 }
 0x14b   : > { %v1510_v51 = vpop.permute.xlu1 %1509  ;;  %v1496_v6 = vpop.permute.xlu0 %1495 }
 0x14c   : > { %v1603_v40 = vcombine.low %v3485_v15, %v1510_v51  ;;  %2373 = vrot.lane.b32.xlu0 %v3495_v61, %s2817_s26 }
 0x14e   : > { %v3503_v37 = vrot.slane %v1603_v40, %v2970_v60 }
 0x14f   : > { %v1500_v36 = vpop.permute.xlu1 %1499  ;;  %v1504_v27 = vpop.permute.xlu0 %1503 }
 0x150   : > { %v1620_v56 = vcombine.high %v3510_v35, %v3503_v37  ;;  %v1520_v4 = vcombine.high %v1496_v6, %v1504_v27  ;;  %v1519_v32 = vcombine.low %v1496_v6, %v1504_v27  ;;  %v3535_v27 = vrot.slane %v2011_v44, %v2970_v60 }
 0x151   : > { %v2009_v44 = vrot.slane %v1995_v10, %v2970_v60  ;;  %v1604_v10 = vcombine.high %v3485_v15, %v1510_v51 }
 0x152   : > { %v3524_v40 = vrot.slane %v1620_v56, %v3226_v14  ;;  %v3538_v11 = vrot.slane %v1520_v4, %v2970_v60  ;;  %v3548_v42 = vrot.slane %v1519_v32, %v2970_v60 }
 0x153   : > { %v1508_v17 = vpop.permute.xlu1 %1507  ;;  %v1266_v16 = vpop.permute.xlu0 %1265  ;;  %v2042_v32 = vcombine.low %v2009_v44, %v3535_v27 }
 0x154   : > { %v1535_v49 = vcombine.low %v1500_v36, %v1508_v17  ;;  %v1536_v45 = vcombine.high %v1500_v36, %v1508_v17  ;;  %1688 = vrot.lane.b32.xlu1 %v3524_v40, %s2817_s26  ;;  %v2249_v36 = vcombine.high %v3463_v62, %v2221_v50  ;;  %v3551_v17 = vrot.slane %v2110_v26, %v3226_v14 }
 0x156   : > { %v3541_v6 = vrot.slane %v1535_v49, %v2970_v60  ;;  %v3544_v59 = vrot.slane %v1536_v45, %v2970_v60  ;;  %v2233_v49 = vcombine.high %v3450_v63, %v3465_v57  ;;  %v3563_v45 = vrot.slane %v2348_v0, %v3226_v14 }
 0x157   : > { %v1270_v48 = vpop.permute.xlu1 %1269  ;;  %v1274_v56 = vpop.permute.xlu0 %1273  ;;  %v2263_v26 = vrot.slane %v2249_v36, %v2970_v60  ;;  %v1588_v0 = vcombine.high %v3471_v47, %v3487_v9 }
 0x158   : > { %2171 = vrot.lane.b32.xlu1 %v3551_v17, %s2818_s27  ;;  %v1552_v50 = vcombine.high %v3548_v42, %v3541_v6  ;;  %v1356_v62 = vcombine.high %v1266_v16, %v1274_v56  ;;  %v1355_v4 = vcombine.low %v1266_v16, %v1274_v56  ;;  %v2247_v30 = vrot.slane %v2233_v49, %v2970_v60 }
 0x15a   : > { %v3571_v57 = vrot.slane %v1552_v50, %v3226_v14  ;;  %v3581_v51 = vrot.slane %v1356_v62, %v2970_v60  ;;  %v3591_v36 = vrot.slane %v1355_v4, %v2970_v60  ;;  %v2280_v56 = vcombine.low %v2247_v30, %v2263_v26 }
 0x15b   : > { %v1278_v52 = vpop.permute.xlu1 %1277  ;;  %v3568_v25 = vpop.permute.xlu0 %1263  ;;  %v1602_v50 = vrot.slane %v1588_v0, %v2970_v60 }
 0x15c   : > { %v1371_v63 = vcombine.low %v1270_v48, %v1278_v52  ;;  %v1372_v46 = vcombine.high %v1270_v48, %v1278_v52  ;;  %2409 = vrot.lane.b32.xlu1 %v3563_v45, %s2818_s27  ;;  %1660 = vrot.lane.b32.xlu0 %v3571_v57, %s2817_s26  ;;  %v1618_v52 = vrot.slane %v1604_v10, %v2970_v60 }
 0x15d   : > { %v3598_v48 = vrot.slane %v2042_v32, %v3226_v14  ;;  %v3612_v32 = vrot.slane %v2280_v56, %v3226_v14  ;;  %v2111_v56 = vcombine.high %v3513_v34, %v3506_v43  ;;  %v2043_v43 = vcombine.high %v2009_v44, %v3535_v27 }
 0x15e   : > { %v3584_v15 = vrot.slane %v1371_v63, %v2970_v60  ;;  %v3587_v16 = vrot.slane %v1372_v46, %v2970_v60  ;;  %v1635_v63 = vcombine.low %v1602_v50, %v1618_v52  ;;  %v2332_v44 = vcombine.low %v3442_v5, %v3439_v31 }
 0x15f   : > { %v3593_v47 = vpop.permute.xlu1 %1267  ;;  %v3595_v9 = vpop.permute.xlu0 %1271  ;;  %v3646_v34 = vrot.slane %v2111_v56, %v3226_v14  ;;  %v3668_v27 = vrot.slane %v2043_v43, %v3226_v14  ;;  %v1636_v56 = vcombine.high %v1602_v50, %v1618_v52  ;;  %v4514_v31 = vcombine.low %v3415_v54, %v3418_v29 }
 0x160   : > { %2143 = vrot.lane.b32.xlu0 %v3598_v48, %s2818_s27  ;;  %v1388_v46 = vcombine.high %v3591_v36, %v3584_v15  ;;  %v1287_v4 = vcombine.low %v3568_v25, %v3595_v9  ;;  %v3696_v50 = vrot.slane %v2332_v44, %v3226_v14  ;;  %v4515_v54 = vmov 0.0  }
 0x161   : > { %v3690_v5 = vrot.slane %v4514_v31, %v3226_v14  ;;  %v3693_v52 = vrot.slane %v1636_v56, %v3226_v14  ;;  %v1619_v44 = vcombine.low %v3510_v35, %v3503_v37  ;;  %v2127_v56 = vcombine.high %v3434_v12, %v4515_v54 }
 0x162   : > { %v3615_v10 = vrot.slane %v1388_v46, %v3226_v14  ;;  %v3624_v49 = vrot.slane %v1287_v4, %v2970_v60  ;;  %v3632_v46 = vrot.slane %v1635_v63, %v3226_v14  ;;  %v1567_v4 = vcombine.low %v3538_v11, %v3544_v59 }
 0x163   : > { %v3609_v62 = vpop.permute.xlu1 %1275  ;;  %v1403_v63 = vcombine.low %v3581_v51, %v3587_v16  ;;  %v3700_v43 = vpop.permute.xlu0 %1903  ;;  %v2126_v29 = vcombine.high %v3690_v5, %v4515_v54  ;;  %v1551_v37 = vcombine.low %v3548_v42, %v3541_v6  ;;  %v2365_v12 = vcombine.high %v3453_v53, %v4515_v54 }
 0x164   : > { %v1303_v0 = vcombine.low %v3593_v47, %v3609_v62  ;;  %2381 = vrot.lane.b32.xlu0 %v3612_v32, %s2818_s27  ;;  %1456 = vrot.lane.b32.xlu1 %v3615_v10, %s2817_s26 }
 0x165   : > { %v3753_v42 = vrot.slane %v1551_v37, %v3226_v14  ;;  %v2059_v37 = vcombine.high %v3474_v20, %v4515_v54  ;;  %v2366_v20 = vcombine.high %v3563_v45, %v4515_v54  ;;  %v1584_v45 = vcombine.high %v3571_v57, %v4515_v54 }
 0x166   : > { %v3627_v38 = vrot.slane %v1303_v0, %v2970_v60  ;;  %v2349_v0 = vcombine.high %v3521_v55, %v3516_v33  ;;  %v2281_v55 = vcombine.high %v2247_v30, %v2263_v26  ;;  %v2026_v30 = vcombine.low %v3461_v23, %v3458_v3 }
 0x167   : > { %v3658_v28 = vpop.permute.xlu1 %1931  ;;  %v2264_v23 = vcombine.low %v3483_v24, %v3480_v39  ;;  %v3728_v31 = vpop.permute.xlu0 %1190  ;;  %v2129_v57 = vcombine.high %v3646_v34, %v4515_v54 }
 0x168   : > { %v1320_v7 = vcombine.high %v3624_v49, %v3627_v38  ;;  %1696 = vrot.lane.b32.xlu1 %v3632_v46, %s2818_s27  ;;  %v3661_v33 = vrot.slane %v2349_v0, %v3226_v14  ;;  %v3684_v26 = vrot.slane %v2281_v55, %v3226_v14  ;;  %v3709_v3 = vrot.slane %v2026_v30, %v3226_v14 }
 0x169   : > { %v2364_v55 = vcombine.high %v3696_v50, %v4515_v54  ;;  %v3722_v39 = vrot.slane %v2264_v23, %v3226_v14  ;;  %v1387_v30 = vcombine.low %v3591_v36, %v3584_v15  ;;  %4516 = vst [vmem:[#allocation42_spill] sm:$0xff] %v3728_v31  ;;  %v3739_v23 = vrot.slane %v1619_v44, %v3226_v14 }
 0x16a   : > { %v3639_v2 = vrot.slane %v1320_v7, %v3226_v14  ;;  %v3654_v7 = vrot.slane %v1567_v4, %v3226_v14  ;;  %v3673_v4 = vrot.slane %v1403_v63, %v3226_v14  ;;  %v2058_v24 = vcombine.high %v3709_v3, %v4515_v54 }
 0x16b   : > { %v3677_v0 = vpop.permute.xlu1 %1218  ;;  %v2296_v35 = vcombine.high %v3722_v39, %v4515_v54  ;;  %v3744_v15 = vrot.slane %v1387_v30, %v3226_v14  ;;  %v3747_v36 = vpop.permute.xlu0 %1911  ;;  %v1651_v6 = vcombine.high %v3739_v23, %v4515_v54  ;;  %v1583_v44 = vcombine.high %v3753_v42, %v4515_v54 }
 0x16c   : > { %1428 = vrot.lane.b32.xlu0 %v3639_v2, %s2817_s26  ;;  %2179 = vrot.lane.b32.xlu1 %v3646_v34, %s2822_s5  ;;  %4513 = vst [vmem:[#allocation41_spill] sm:$0xff] %v3677_v0  ;;  %v2367_v34 = vcombine.high %v3661_v33, %v4515_v54 }
 0x16d   : > { %v1419_v53 = vcombine.high %v3744_v15, %v4515_v54 }
 0x16f   : > { %v3711_v63 = vpop.permute.xlu1 %1939 }
 0x170   : > { %1668 = vrot.lane.b32.xlu0 %v3654_v7, %s2818_s27  ;;  %2417 = vrot.lane.b32.xlu1 %v3661_v33, %s2822_s5  ;;  %v2299_v33 = vcombine.high %v3684_v26, %v4515_v54 }
 0x174   : > { %2151 = vrot.lane.b32.xlu0 %v3668_v27, %s2822_s5  ;;  %1464 = vrot.lane.b32.xlu1 %v3673_v4, %s2818_s27 }
 0x178   : > { %2389 = vrot.lane.b32.xlu0 %v3684_v26, %s2822_s5  ;;  %1704 = vrot.lane.b32.xlu1 %v3693_v52, %s2822_s5 }
 0x17c   : > { %2159 = vrot.lane.b32.xlu0 %v2126_v29, %s2819_s28  ;;  %2397 = vrot.lane.b32.xlu1 %v2364_v55, %s2819_s28  ;;  %v3731_v29 = vpop.permute.xlu1 %1226 }
 0x17d   : > { %4517 = vst [vmem:[#allocation43_spill] sm:$0xff] %v3731_v29 }
 0x180   : > { %2131 = vrot.lane.b32.xlu0 %v2058_v24, %s2819_s28  ;;  %2167 = vrot.lane.b32.xlu1 %v2127_v56, %s2820_s29  ;;  %v3755_v55 = vpop.permute.xlu1 %1927  ;;  %v1652_v24 = vcombine.high %v3524_v40, %v4515_v54  ;;  %v3765_v56 = vpop.permute.xlu0 %1899 }
 0x184   : > { %2369 = vrot.lane.b32.xlu0 %v2296_v35, %s2819_s28  ;;  %2405 = vrot.lane.b32.xlu1 %v2365_v12, %s2820_s29  ;;  %v3768_v30 = vpop.permute.xlu1 %1935  ;;  %v1319_v35 = vcombine.low %v3624_v49, %v3627_v38  ;;  %v2128_v12 = vcombine.high %v3551_v17, %v4515_v54  ;;  %v3778_v40 = vpop.permute.xlu0 %1214  ;;  %v1420_v17 = vcombine.high %v3615_v10, %v4515_v54 }
 0x185   : > { %4518 = vst [vmem:[#allocation44_spill] sm:$0xff] %v3778_v40  ;;  %v2060_v10 = vcombine.high %v3598_v48, %v4515_v54 }
 0x188   : > { %1684 = vrot.lane.b32.xlu0 %v1651_v6, %s2819_s28  ;;  %1452 = vrot.lane.b32.xlu1 %v1419_v53, %s2819_s28  ;;  %v2297_v6 = vcombine.high %v3495_v61, %v4515_v54  ;;  %v3784_v53 = vrot.slane %v1319_v35, %v3226_v14  ;;  %v3796_v49 = vpop.permute.xlu0 %1186  ;;  %v1066_v35 = vcombine.high %v3176_v18, %v3186_v22 }
 0x189   : > { %4520 = vst [vmem:[#allocation46_spill] sm:$0xff] %v3796_v49  ;;  %v1304_v18 = vcombine.high %v3593_v47, %v3609_v62  ;;  %v1352_v47 = vcombine.high %v3639_v2, %v4515_v54  ;;  %v1585_v2 = vcombine.high %v3654_v7, %v4515_v54 }
 0x18a   : > { %v1351_v38 = vcombine.high %v3784_v53, %v4515_v54  ;;  %v3825_v48 = vrot.slane %v1066_v35, %v2970_v60  ;;  %v941_v35 = vcombine.high %v3359_v8, %v4515_v54  ;;  %v4530_v8 = vcombine.high %v3041_v21, %v3035_v19 }
 0x18b   : > { %v3845_v62 = vrot.slane %v1304_v18, %v2970_v60  ;;  %v1183_v18 = vcombine.high %v3262_v58, %v4515_v54  ;;  %v1421_v19 = vcombine.high %v3673_v4, %v4515_v54  ;;  %v4540_v4 = vld [vmem:[#allocation19_spill] sm:$0xff] }
 0x18c   : > { %1656 = vrot.lane.b32.xlu0 %v1583_v44, %s2819_s28  ;;  %1692 = vrot.lane.b32.xlu1 %v1652_v24, %s2820_s29  ;;  %v3788_v44 = vpop.permute.xlu1 %1222  ;;  %v1653_v24 = vcombine.high %v3632_v46, %v4515_v54  ;;  %v1050_v46 = vcombine.high %v3160_v1, %v3171_v13  ;;  %v1288_v13 = vcombine.high %v3568_v25, %v3595_v9 }
 0x18d   : > { %4519 = vst [vmem:[#allocation45_spill] sm:$0xff] %v3788_v44 }
 0x18e   : > { %v3835_v1 = vrot.slane %v1050_v46, %v2970_v60  ;;  %v3853_v25 = vrot.slane %v1288_v13, %v2970_v60  ;;  %v4528_v46 = vcombine.high %v3538_v11, %v3544_v59  ;;  %v4531_v13 = vld [vmem:[#allocation8_spill] sm:$0xff] }
 0x18f   : > { %v4532_v11 = vcombine.low %v3075_v41, %v4531_v13 }
 0x190   : > { %2139 = vrot.lane.b32.xlu0 %v2059_v37, %s2820_s29  ;;  %2175 = vrot.lane.b32.xlu1 %v2128_v12, %s2821_s30  ;;  %v3799_v61 = vpop.permute.xlu1 %1943  ;;  %v3807_v37 = vpop.permute.xlu0 %1907 }
 0x191   : > { %v3900_v59 = vrot.slane %v4532_v11, %v3226_v14 }
 0x193   : > { %4533 = vst [vmem:[#allocation8_spill] sm:$0xff] %v3900_v59  ;;  %v387_v21 = vcombine.high %v3900_v59, %v4515_v54 }
 0x194   : > { %2377 = vrot.lane.b32.xlu0 %v2297_v6, %s2820_s29  ;;  %2413 = vrot.lane.b32.xlu1 %v2366_v20, %s2821_s30  ;;  %v3814_v12 = vpop.permute.xlu1 %1947  ;;  %v2298_v6 = vcombine.high %v3612_v32, %v4515_v54  ;;  %v3829_v22 = vpop.permute.xlu0 %1194  ;;  %v1097_v20 = vcombine.low %v3835_v1, %v3825_v48 }
 0x195   : > { %4521 = vst [vmem:[#allocation47_spill] sm:$0xff] %v3829_v22  ;;  %v4559_v22 = vld [vmem:[#allocation32_spill] sm:$0xff] }
 0x196   : > { %v1105_v26 = vrot.slane %v1097_v20, %v3226_v14  ;;  %v4537_v20 = vld [vmem:[#allocation20_spill] sm:$0xff] }
 0x198   : > { %1424 = vrot.lane.b32.xlu0 %v1351_v38, %s2819_s28  ;;  %1460 = vrot.lane.b32.xlu1 %v1420_v17, %s2820_s29  ;;  %v3839_v32 = vpop.permute.xlu1 %739  ;;  %v3855_v9 = vpop.permute.xlu0 %1915  ;;  %v1335_v38 = vcombine.low %v3853_v25, %v3845_v62 }
 0x199   : > { %4522 = vst [vmem:[#allocation48_spill] sm:$0xff] %v3839_v32  ;;  %4523 = vst [vmem:[#allocation49_spill] sm:$0xff] %v3855_v9 }
 0x19a   : > { %v1343_v7 = vrot.slane %v1335_v38, %v3226_v14 }
 0x19c   : > { %1664 = vrot.lane.b32.xlu0 %v1584_v45, %s2820_s29  ;;  %1700 = vrot.lane.b32.xlu1 %v1653_v24, %s2821_s30  ;;  %v3862_v17 = vpop.permute.xlu1 %977  ;;  %v2061_v45 = vcombine.high %v3668_v27, %v4515_v54  ;;  %v3869_v24 = vpop.permute.xlu0 %488  ;;  %v1582_v27 = vrot.slane %v4528_v46, %v3226_v14 }
 0x19d   : > { %4524 = vst [vmem:[#allocation50_spill] sm:$0xff] %v3862_v17  ;;  %4525 = vst [vmem:[#allocation51_spill] sm:$0xff] %v3869_v24 }
 0x1a0   : > { %2147 = vrot.lane.b32.xlu0 %v2060_v10, %s2821_s30  ;;  %2183 = vrot.lane.b32.xlu1 %v2129_v57, %s2823_s6  ;;  %v3871_v10 = vpop.permute.xlu1 %711 }
 0x1a1   : > { %4526 = vst [vmem:[#allocation52_spill] sm:$0xff] %v3871_v10 }
 0x1a4   : > { %2385 = vrot.lane.b32.xlu0 %v2298_v6, %s2821_s30  ;;  %2421 = vrot.lane.b32.xlu1 %v2367_v34, %s2823_s6  ;;  %v3878_v57 = vpop.permute.xlu1 %949  ;;  %v3885_v6 = vpop.permute.xlu0 %735  ;;  %v3894_v34 = vrot.slane %v4530_v8, %v3226_v14  ;;  %v4541_v8 = vld [vmem:[#allocation17_spill] sm:$0xff] }
 0x1a5   : > { %4527 = vst [vmem:[#allocation53_spill] sm:$0xff] %v3878_v57  ;;  %4529 = vst [vmem:[#allocation54_spill] sm:$0xff] %v3885_v6  ;;  %v639_v11 = vcombine.high %v4541_v8, %v4540_v4  ;;  %v4548_v4 = vld [vmem:[#allocation21_spill] sm:$0xff] }
 0x1a8   : > { %1432 = vrot.lane.b32.xlu0 %v1352_v47, %s2820_s29  ;;  %2393 = vrot.lane.b32.xlu1 %v2299_v33, %s2823_s6  ;;  %v3903_v47 = vpop.permute.xlu0 %707  ;;  %v3905_v33 = vpop.permute.xlu1 %973 }
 0x1a9   : > { %4534 = vst [vmem:[#allocation55_spill] sm:$0xff] %v3903_v47  ;;  %4535 = vst [vmem:[#allocation56_spill] sm:$0xff] %v3905_v33  ;;  %v4556_v47 = vld [vmem:[#allocation36_spill] sm:$0xff] }
 0x1ac   : > { %1672 = vrot.lane.b32.xlu0 %v1585_v2, %s2821_s30  ;;  %1198 = vrot.lane.b32.xlu1 %v1105_v26, %s2818_s27  ;;  %v3914_v58 = vpop.permute.xlu0 %945  ;;  %v4538_v2 = vld [vmem:[#allocation18_spill] sm:$0xff] }
 0x1ad   : > { %4536 = vst [vmem:[#allocation57_spill] sm:$0xff] %v3914_v58  ;;  %v655_v38 = vcombine.high %v4538_v2, %v4537_v20  ;;  %v4543_v20 = vld [vmem:[#allocation22_spill] sm:$0xff] }
 0x1b0   : > { %2155 = vrot.lane.b32.xlu0 %v2061_v45, %s2823_s6  ;;  %1436 = vrot.lane.b32.xlu1 %v1343_v7, %s2818_s27  ;;  %v1654_v45 = vcombine.high %v3693_v52, %v4515_v54  ;;  %v4544_v52 = vld [vmem:[#allocation25_spill] sm:$0xff]  ;;  %v3938_v58 = vpop.permute.xlu0 %743 }
 0x1b1   : > { %v1897_v24 = vcombine.high %v4544_v52, %v4515_v54  ;;  %4546 = vst [vmem:[#allocation20_spill] sm:$0xff] %v3938_v58  ;;  %v4550_v52 = vld [vmem:[#allocation7_spill] sm:$0xff]  ;;  %v1353_v58 = vcombine.high %v1343_v7, %v4515_v54  ;;  %v1586_v7 = vcombine.high %v1582_v27, %v4515_v54 }
 0x1b4   : > { %981 = vrot.lane.b32.xlu0 %v941_v35, %s2820_s29  ;;  %1676 = vrot.lane.b32.xlu1 %v1582_v27, %s2822_s5  ;;  %v4539_v35 = vld [vmem:[#allocation37_spill] sm:$0xff] }
 0x1b5   : > { %v635_v46 = vcombine.high %v4539_v35, %v4515_v54  ;;  %v4545_v35 = vld [vmem:[#allocation39_spill] sm:$0xff] }
 0x1b6   : > { %v873_v57 = vcombine.high %v4545_v35, %v4515_v54 }
 0x1b8   : > { %1230 = vrot.lane.b32.xlu0 %v1183_v18, %s2821_s30  ;;  %1919 = vrot.lane.b32.xlu1 %v3894_v34, %s2822_s5  ;;  %v3923_v18 = vpop.permute.xlu1 %2163 }
 0x1bc   : > { %1468 = vrot.lane.b32.xlu0 %v1421_v19, %s2821_s30  ;;  %460 = vrot.lane.b32.xlu1 %v387_v21, %s2819_s28  ;;  %v3930_v19 = vrot.slane %v655_v38, %v2970_v60  ;;  %v4542_v21 = vld [vmem:[#allocation26_spill] sm:$0xff]  ;;  %v3940_v59 = vpop.permute.xlu1 %2401 }
 0x1bd   : > { %v893_v2 = vcombine.high %v4543_v20, %v4542_v21  ;;  %v4549_v20 = vld [vmem:[#allocation6_spill] sm:$0xff] }
 0x1be   : > { %v4551_v35 = vcombine.high %v4549_v20, %v4550_v52  ;;  %v4553_v20 = vld [vmem:[#allocation29_spill] sm:$0xff] }
 0x1bf   : > { %v3952_v21 = vrot.slane %v893_v2, %v2970_v60 }
 0x1c0   : > { %1708 = vrot.lane.b32.xlu0 %v1654_v45, %s2823_s6  ;;  %715 = vrot.lane.b32.xlu1 %v635_v46, %s2820_s29  ;;  %v3943_v45 = vrot.slane %v639_v11, %v2970_v60  ;;  %v4547_v46 = vld [vmem:[#allocation23_spill] sm:$0xff]  ;;  %v438_v17 = vrot.slane %v4551_v35, %v3226_v14  ;;  %v3958_v11 = vpop.permute.xlu0 %2135 }
 0x1c1   : > { %v877_v38 = vcombine.high %v4548_v4, %v4547_v46  ;;  %v1115_v46 = vcombine.high %v1105_v26, %v4515_v54  ;;  %v4552_v4 = vld [vmem:[#allocation31_spill] sm:$0xff]  ;;  %v4554_v26 = vld [vmem:[#allocation30_spill] sm:$0xff] }
 0x1c2   : > { %v686_v8 = vcombine.low %v3943_v45, %v3930_v19  ;;  %v587_v52 = vcombine.high %v4553_v20, %v4552_v4  ;;  %v4557_v4 = vld [vmem:[#allocation33_spill] sm:$0xff] }
 0x1c3   : > { %v825_v20 = vcombine.high %v4557_v4, %v4556_v47 }
 0x1c4   : > { %1951 = vrot.lane.b32.xlu0 %v1897_v24, %s2823_s6  ;;  %953 = vrot.lane.b32.xlu1 %v873_v57, %s2820_s29  ;;  %v3964_v24 = vrot.slane %v877_v38, %v2970_v60  ;;  %v694_v2 = vrot.slane %v686_v8, %v3226_v14  ;;  %v3973_v35 = vpop.permute.xlu0 %2373  ;;  %v4555_v38 = vld [vmem:[#allocation27_spill] sm:$0xff]  ;;  %v3984_v8 = vrot.slane %v587_v52, %v2970_v60  ;;  %v4561_v52 = vld [vmem:[#allocation4_spill] sm:$0xff] }
 0x1c5   : > { %v571_v33 = vcombine.high %v4555_v38, %v4554_v26  ;;  %v4558_v38 = vld [vmem:[#allocation34_spill] sm:$0xff]  ;;  %v4005_v27 = vrot.slane %v825_v20, %v2970_v60 }
 0x1c6   : > { %v3960_v10 = vpop.permute.xlu1 %1688  ;;  %v924_v57 = vcombine.low %v3964_v24, %v3952_v21 }
 0x1c7   : > { %v3993_v26 = vrot.slane %v571_v33, %v2970_v60  ;;  %v4563_v33 = vcombine.high %v3075_v41, %v4531_v13  ;;  %v1829_v13 = vcombine.high %v3894_v34, %v4515_v54 }
 0x1c8   : > { %492 = vrot.lane.b32.xlu0 %v438_v17, %s2817_s26  ;;  %1202 = vrot.lane.b32.xlu1 %v1115_v46, %s2821_s30  ;;  %v932_v46 = vrot.slane %v924_v57, %v3226_v14  ;;  %v4560_v57 = vld [vmem:[#allocation5_spill] sm:$0xff] }
 0x1c9   : > { %v4562_v31 = vcombine.high %v4560_v57, %v4561_v52  ;;  %v618_v47 = vcombine.low %v3993_v26, %v3984_v8 }
 0x1ca   : > { %v3979_v32 = vpop.permute.xlu1 %2171 }
 0x1cb   : > { %v1180_v49 = vrot.slane %v4562_v31, %v3226_v14  ;;  %v4564_v31 = vcombine.high %v3581_v51, %v3587_v16  ;;  %v626_v41 = vrot.slane %v618_v47, %v3226_v14  ;;  %v1098_v16 = vcombine.high %v3835_v1, %v3825_v48 }
 0x1cc   : > { %747 = vrot.lane.b32.xlu0 %v694_v2, %s2818_s27  ;;  %1440 = vrot.lane.b32.xlu1 %v1353_v58, %s2821_s30  ;;  %v809_v58 = vcombine.high %v4559_v22, %v4558_v38  ;;  %v370_v22 = vrot.slane %v4563_v33, %v3226_v14  ;;  %v456_v33 = vcombine.high %v438_v17, %v4515_v54 }
 0x1cd   : > { %v1418_v20 = vrot.slane %v4564_v31, %v3226_v14  ;;  %v1336_v31 = vcombine.high %v3853_v25, %v3845_v62  ;;  %v1112_v34 = vrot.slane %v1098_v16, %v3226_v14  ;;  %v704_v1 = vcombine.high %v694_v2, %v4515_v54 }
 0x1ce   : > { %v3988_v6 = vpop.permute.xlu0 %1660  ;;  %v4007_v4 = vpop.permute.xlu1 %2409  ;;  %v942_v25 = vcombine.high %v932_v46, %v4515_v54  ;;  %v388_v16 = vcombine.high %v370_v22, %v4515_v54 }
 0x1cf   : > { %v1422_v44 = vcombine.high %v1418_v20, %v4515_v54 }
 0x1d0   : > { %985 = vrot.lane.b32.xlu0 %v932_v46, %s2818_s27  ;;  %1680 = vrot.lane.b32.xlu1 %v1586_v7, %s2823_s6  ;;  %v4017_v7 = vrot.slane %v809_v58, %v2970_v60 }
 0x1d2   : > { %v4013_v38 = vpop.permute.xlu0 %2143  ;;  %v856_v57 = vcombine.low %v4017_v7, %v4005_v27 }
 0x1d4   : > { %1234 = vrot.lane.b32.xlu0 %v1180_v49, %s2822_s5  ;;  %464 = vrot.lane.b32.xlu1 %v370_v22, %s2817_s26  ;;  %v864_v51 = vrot.slane %v856_v57, %v3226_v14 }
 0x1d6   : > { %v4026_v52 = vpop.permute.xlu1 %1456  ;;  %v4031_v60 = vpop.permute.xlu0 %2381 }
 0x1d8   : > { %1472 = vrot.lane.b32.xlu0 %v1418_v20, %s2822_s5  ;;  %719 = vrot.lane.b32.xlu1 %v626_v41, %s2818_s27  ;;  %v1116_v20 = vcombine.high %v1112_v34, %v4515_v54 }
 0x1da   : > { %v4035_v58 = vpop.permute.xlu1 %1696 }
 0x1dc   : > { %1923 = vrot.lane.b32.xlu0 %v1829_v13, %s2823_s6  ;;  %957 = vrot.lane.b32.xlu1 %v864_v51, %s2818_s27  ;;  %v1350_v13 = vrot.slane %v1336_v31, %v3226_v14 }
 0x1de   : > { %v4042_v47 = vpop.permute.xlu0 %1428  ;;  %v4047_v29 = vpop.permute.xlu1 %2179 }
 0x1e0   : > { %496 = vrot.lane.b32.xlu0 %v456_v33, %s2820_s29  ;;  %1206 = vrot.lane.b32.xlu1 %v1112_v34, %s2822_s5  ;;  %v1184_v33 = vcombine.high %v1180_v49, %v4515_v54  ;;  %v687_v49 = vcombine.high %v3943_v45, %v3930_v19 }
 0x1e2   : > { %v4052_v48 = vpop.permute.xlu0 %1668  ;;  %v4055_v57 = vpop.permute.xlu1 %2417  ;;  %v701_v45 = vrot.slane %v687_v49, %v3226_v14 }
 0x1e4   : > { %751 = vrot.lane.b32.xlu0 %v704_v1, %s2821_s30  ;;  %1444 = vrot.lane.b32.xlu1 %v1350_v13, %s2822_s5  ;;  %v636_v1 = vcombine.high %v626_v41, %v4515_v54  ;;  %v4565_v41 = vld [vmem:[#allocation9_spill] sm:$0xff] }
 0x1e6   : > { %v4060_v62 = vpop.permute.xlu0 %2151  ;;  %v4063_v17 = vpop.permute.xlu1 %1464 }
 0x1e8   : > { %989 = vrot.lane.b32.xlu0 %v942_v25, %s2821_s30  ;;  %468 = vrot.lane.b32.xlu1 %v388_v16, %s2820_s29  ;;  %v874_v25 = vcombine.high %v864_v51, %v4515_v54 }
 0x1ea   : > { %v4068_v2 = vpop.permute.xlu0 %2389  ;;  %v4071_v31 = vpop.permute.xlu1 %1704 }
 0x1ec   : > { %1238 = vrot.lane.b32.xlu0 %v1184_v33, %s2823_s6  ;;  %723 = vrot.lane.b32.xlu1 %v636_v1, %s2821_s30  ;;  %v4566_v33 = vld [vmem:[#allocation10_spill] sm:$0xff] }
 0x1ed   : > { %v4567_v0 = vcombine.low %v4565_v41, %v4566_v33 }
 0x1ee   : > { %v2160_v46 = vpop.permute.xlu0 %2159  ;;  %v2398_v22 = vpop.permute.xlu1 %2397 }
 0x1ef   : > { %v447_v1 = vrot.slane %v4567_v0, %v3226_v14  ;;  %v2431_v51 = vsel %vm515_vm5, %v3696_v50, %v2398_v22  ;;  %v619_v0 = vcombine.high %v3993_v26, %v3984_v8  ;;  %v4568_v22 = vld [vmem:[#allocation11_spill] sm:$0xff]  ;;  %v857_v26 = vcombine.high %v4017_v7, %v4005_v27 }
 0x1f0   : > { %1476 = vrot.lane.b32.xlu0 %v1422_v44, %s2823_s6  ;;  %961 = vrot.lane.b32.xlu1 %v874_v25, %s2821_s30  ;;  %v925_v44 = vcombine.high %v3964_v24, %v3952_v21  ;;  %v2432_v34 = vsel %vm517_vm6, %v2431_v51, %v3940_v59  ;;  %v4569_v25 = vld [vmem:[#allocation12_spill] sm:$0xff] }
 0x1f1   : > { %v633_v51 = vrot.slane %v619_v0, %v3226_v14  ;;  %v871_v0 = vrot.slane %v857_v26, %v3226_v14  ;;  %v705_v26 = vcombine.high %v701_v45, %v4515_v54 }
 0x1f2   : > { %v4082_v16 = vpop.permute.xlu0 %2131  ;;  %v2168_v40 = vpop.permute.xlu1 %2167  ;;  %v939_v59 = vrot.slane %v925_v44, %v3226_v14 }
 0x1f4   : > { %500 = vrot.lane.b32.xlu0 %v447_v1, %s2818_s27  ;;  %1210 = vrot.lane.b32.xlu1 %v1116_v20, %s2823_s6  ;;  %v4570_v20 = vcombine.low %v4568_v22, %v4569_v25 }
 0x1f6   : > { %v4095_v19 = vpop.permute.xlu0 %2369  ;;  %v2406_v50 = vpop.permute.xlu1 %2405  ;;  %v379_v9 = vrot.slane %v4570_v20, %v3226_v14  ;;  %v1354_v20 = vcombine.high %v1350_v13, %v4515_v54 }
 0x1f7   : > { %v2433_v21 = vsel %vm519_vm7, %v2432_v34, %v2406_v50 }
 0x1f8   : > { %755 = vrot.lane.b32.xlu0 %v701_v45, %s2822_s5  ;;  %472 = vrot.lane.b32.xlu1 %v379_v9, %s2818_s27  ;;  %v4111_v24 = vsel %vm521_vm8, %v2433_v21, %v4007_v4 }
 0x1fa   : > { %v1685_v8 = vpop.permute.xlu0 %1684  ;;  %v1453_v49 = vpop.permute.xlu1 %1452 }
 0x1fb   : > { %v1486_v34 = vsel %vm515_vm5, %v3744_v15, %v1453_v49  ;;  %v1718_v50 = vsel %vm515_vm5, %v3739_v23, %v1685_v8  ;;  %v389_v8 = vcombine.high %v379_v9, %v4515_v54  ;;  %v4571_v9 = vcombine.high %v4568_v22, %v4569_v25 }
 0x1fc   : > { %993 = vrot.lane.b32.xlu0 %v939_v59, %s2822_s5  ;;  %727 = vrot.lane.b32.xlu1 %v633_v51, %s2822_s5  ;;  %v1487_v4 = vsel %vm517_vm6, %v1486_v34, %v4026_v52  ;;  %v1719_v7 = vsel %vm517_vm6, %v1718_v50, %v3960_v10  ;;  %v457_v52 = vcombine.high %v447_v1, %v4515_v54 }
 0x1fd   : > { %v637_v34 = vcombine.high %v633_v51, %v4515_v54  ;;  %v386_v50 = vrot.slane %v4571_v9, %v3226_v14 }
 0x1fe   : > { %v1657_v44 = vpop.permute.xlu0 %1656  ;;  %v1693_v27 = vpop.permute.xlu1 %1692 }
 0x1ff   : > { %v1720_v15 = vsel %vm519_vm7, %v1719_v7, %v1693_v27  ;;  %v1711_v51 = vsel %vm515_vm5, %v3753_v42, %v1657_v44 }
 0x200   : > { %1448 = vrot.lane.b32.xlu0 %v1354_v20, %s2823_s6  ;;  %965 = vrot.lane.b32.xlu1 %v871_v0, %s2822_s5  ;;  %v1721_v23 = vsel %vm521_vm8, %v1720_v15, %v4035_v58  ;;  %v2193_v58 = vsel %vm515_vm5, %v3690_v5, %v2160_v46  ;;  %v943_v20 = vcombine.high %v939_v59, %v4515_v54 }
 0x201   : > { %v2194_v45 = vsel %vm517_vm6, %v2193_v58, %v3923_v18  ;;  %v1712_v42 = vsel %vm517_vm6, %v1711_v51, %v3988_v6  ;;  %v2424_v6 = vsel %vm515_vm5, %v3722_v39, %v4095_v19 }
 0x202   : > { %v4134_v21 = vpop.permute.xlu0 %2139  ;;  %v2176_v13 = vpop.permute.xlu1 %2175  ;;  %v2195_v46 = vsel %vm519_vm7, %v2194_v45, %v2168_v40  ;;  %v4572_v40 = vcombine.high %v4565_v41, %v4566_v33  ;;  %v875_v33 = vcombine.high %v871_v0, %v4515_v54  ;;  %v2425_v39 = vsel %vm517_vm6, %v2424_v6, %v3973_v35 }
 0x203   : > { %v2186_v35 = vsel %vm515_vm5, %v3709_v3, %v4082_v16 }
 0x204   : > { %504 = vrot.lane.b32.xlu0 %v457_v52, %s2821_s30  ;;  %476 = vrot.lane.b32.xlu1 %v389_v8, %s2821_s30  ;;  %v454_v59 = vrot.slane %v4572_v40, %v3226_v14 }
 0x206   : > { %v2378_v10 = vpop.permute.xlu0 %2377  ;;  %v2414_v49 = vpop.permute.xlu1 %2413  ;;  %v458_v0 = vcombine.high %v454_v59, %v4515_v54 }
 0x207   : > { %v2426_v52 = vsel %vm519_vm7, %v2425_v39, %v2378_v10 }
 0x208   : > { %759 = vrot.lane.b32.xlu0 %v705_v26, %s2823_s6  ;;  %731 = vrot.lane.b32.xlu1 %v637_v34, %s2823_s6 }
 0x20a   : > { %v1425_v1 = vpop.permute.xlu0 %1424  ;;  %v1461_v27 = vpop.permute.xlu1 %1460 }
 0x20b   : > { %v1479_v5 = vsel %vm515_vm5, %v3784_v53, %v1425_v1  ;;  %v1488_v7 = vsel %vm519_vm7, %v1487_v4, %v1461_v27  ;;  %v390_v53 = vcombine.high %v386_v50, %v4515_v54  ;;  %v2187_v54 = vsel %vm517_vm6, %v2186_v35, %v3958_v11 }
 0x20c   : > { %997 = vrot.lane.b32.xlu0 %v943_v20, %s2823_s6  ;;  %v1480_v22 = vsel %vm517_vm6, %v1479_v5, %v4042_v47  ;;  %480 = vrot.lane.b32.xlu1 %v386_v50, %s2822_s5  ;;  %v4165_v18 = vsel %vm521_vm8, %v1488_v7, %v4063_v17  ;;  %v2196_v47 = vsel %vm521_vm8, %v2195_v46, %v3979_v32 }
 0x20d   : > { %v2197_v44 = vsel %vm523_vm9, %v2196_v47, %v2176_v13  ;;  %v2188_v3 = vsel %vm519_vm7, %v2187_v54, %v4134_v21  ;;  %v4575_v54 = vld [vmem:[#allocation49_spill] sm:$0xff] }
 0x20e   : > { %v1665_v25 = vpop.permute.xlu0 %1664  ;;  %v1701_v4 = vpop.permute.xlu1 %1700  ;;  %v2189_v1 = vsel %vm521_vm8, %v2188_v3, %v4013_v38 }
 0x20f   : > { %v1713_v17 = vsel %vm519_vm7, %v1712_v42, %v1665_v25  ;;  %v1722_v15 = vsel %vm523_vm9, %v1721_v23, %v1701_v4  ;;  %v2198_v23 = vsel %vm525_vm10, %v2197_v44, %v4047_v29  ;;  %v4573_v25 = vld [vmem:[#allocation15_spill] sm:$0xff] }
 0x210   : > { %508 = vrot.lane.b32.xlu0 %v454_v59, %s2822_s5  ;;  %v4185_v14 = vsel %vm521_vm8, %v1713_v17, %v4052_v48  ;;  %484 = vrot.lane.b32.xlu1 %v390_v53, %s2823_s6  ;;  %v1723_v32 = vsel %vm525_vm10, %v1722_v15, %v4071_v31  ;;  %v2435_v48 = vsel %vm523_vm9, %v4111_v24, %v2414_v49 }
 0x211   : > { %v2436_v29 = vsel %vm525_vm10, %v2435_v48, %v4055_v57  ;;  %v2427_v24 = vsel %vm521_vm8, %v2426_v52, %v4031_v60 }
 0x212   : > { %v2148_v41 = vpop.permute.xlu0 %2147  ;;  %v2184_v19 = vpop.permute.xlu1 %2183 }
 0x213   : > { %v2199_v13 = vsel %vm527_vm11, %v2198_v23, %v2184_v19  ;;  %v2190_v11 = vsel %vm523_vm9, %v2189_v1, %v2148_v41 }
 0x214   : > { %969 = vrot.lane.b32.xlu0 %v875_v33, %s2823_s6  ;;  %v2203_v31 = vrot.slane %v2199_v13, 4  ;;  %v2191_v21 = vsel %vm525_vm10, %v2190_v11, %v4060_v62  ;;  %v1961_v62 = vsel %vm515_vm5, %v4573_v25, %v3755_v55 }
 0x215   : > { %v1962_v59 = vsel %vm517_vm6, %v1961_v62, %v3658_v28 }
 0x216   : > { %v2386_v8 = vpop.permute.xlu0 %2385  ;;  %2207 = vst [vmem:[#allocation3 + $0x20] sm:$0xf0] %v2203_v31  ;;  %v2422_v26 = vpop.permute.xlu1 %2421  ;;  %v1963_v47 = vsel %vm519_vm7, %v1962_v59, %v3768_v30  ;;  %v4574_v31 = vld [vmem:[#allocation13_spill] sm:$0xff] }
 0x217   : > { %v2437_v10 = vsel %vm527_vm11, %v2436_v29, %v2422_v26  ;;  %v2428_v49 = vsel %vm523_vm9, %v2427_v24, %v2386_v8  ;;  %v1964_v44 = vsel %vm521_vm8, %v1963_v47, %v3711_v63  ;;  %v1954_v8 = vsel %vm515_vm5, %v4574_v31, %v3765_v56 }
 0x218   : > { %512 = vrot.lane.b32.xlu0 %v458_v0, %s2823_s6  ;;  %2439 = vst [vmem:[#allocation3 + $0x38] sm:$0xf] %v2437_v10  ;;  %v2429_v57 = vsel %vm525_vm10, %v2428_v49, %v4068_v2  ;;  %v1965_v55 = vsel %vm523_vm9, %v1964_v44, %v3799_v61  ;;  %v1955_v26 = vsel %vm517_vm6, %v1954_v8, %v3700_v43 }
 0x219   : > { %v1966_v41 = vsel %vm525_vm10, %v1965_v55, %v3814_v12 }
 0x21a   : > { %v1433_v34 = vpop.permute.xlu0 %1432  ;;  %v2394_v16 = vpop.permute.xlu1 %2393 }
 0x21b   : > { %v1481_v60 = vsel %vm519_vm7, %v1480_v22, %v1433_v34  ;;  %v2430_v58 = vsel %vm527_vm11, %v2429_v57, %v2394_v16 }
 0x21c   : > { %2438 = vst [vmem:[#allocation3 + $0x40] sm:$0xf] %v2430_v58  ;;  %v4577_v58 = vld [vmem:[#allocation14_spill] sm:$0xff] }
 0x21e   : > { %v1673_v9 = vpop.permute.xlu0 %1672  ;;  %v4222_v50 = vpop.permute.xlu1 %1198 }
 0x21f   : > { %v2450_v20 = vld [vmem:[#allocation3 + $0x38] sm:$0xf]  ;;  %v1715_v61 = vsel %vm523_vm9, %v4185_v14, %v1673_v9  ;;  %v1956_v14 = vsel %vm519_vm7, %v1955_v26, %v3807_v37 }
 0x220   : > { %2735 = vmatprep.subr.msk.mxu0 %vm2455_vm12, %v2450_v20  ;;  %v1957_v49 = vsel %vm521_vm8, %v1956_v14, %v3747_v36  ;;  %v4578_v20 = vld [vmem:[#allocation41_spill] sm:$0xff] }
 0x221   : > { %v1958_v56 = vsel %vm523_vm9, %v1957_v49, %v4575_v54 }
 0x222   : > { %v2156_v2 = vpop.permute.xlu0 %2155  ;;  %v1437_v45 = vpop.permute.xlu1 %1436 }
 0x223   : > { %v2192_v51 = vsel %vm527_vm11, %v2191_v21, %v2156_v2  ;;  %v4228_v27 = vsel %vm521_vm8, %v1481_v60, %v1437_v45  ;;  %v2449_v38 = vld [vmem:[#allocation3 + $0x40] sm:$0xf]  ;;  %v4576_v60 = vld [vmem:[#allocation44_spill] sm:$0xff]  ;;  %v4579_v2 = vld [vmem:[#allocation45_spill] sm:$0xff] }
 0x224   : > { %v2202_v5 = vrot.slane %v2192_v51, 4  ;;  %2736 = vmatpush1.msk.msra.mxu0 %vm2455_vm12, %v2449_v38  ;;  %v1248_v1 = vsel %vm515_vm5, %v4577_v58, %v4576_v60  ;;  %v4580_v38 = vld [vmem:[#allocation43_spill] sm:$0xff] }
 0x225   : > { %v1249_v21 = vsel %vm517_vm6, %v1248_v1, %v4578_v20  ;;  %v4587_v58 = vld [vmem:[#allocation55_spill] sm:$0xff]  ;;  %v4589_v20 = vld [vmem:[#allocation48_spill] sm:$0xff] }
 0x226   : > { %2206 = vst [vmem:[#allocation3 + $0x8] sm:$0xf0] %v2202_v5  ;;  %v4230_v46 = vpop.permute.xlu0 %981  ;;  %v1677_v7 = vpop.permute.xlu1 %1676  ;;  %v1250_v45 = vsel %vm519_vm7, %v1249_v21, %v4579_v2  ;;  %v4588_v1 = vld [vmem:[#allocation35_spill] sm:$0xff] }
 0x227   : > { %v1716_v48 = vsel %vm525_vm10, %v1715_v61, %v1677_v7  ;;  %v1251_v7 = vsel %vm521_vm8, %v1250_v45, %v4580_v38  ;;  %v4592_v45 = vld [vmem:[#allocation20_spill] sm:$0xff] }
 0x22a   : > { %v1231_v22 = vpop.permute.xlu0 %1230  ;;  %v1920_v42 = vpop.permute.xlu1 %1919 }
 0x22b   : > { %v1959_v34 = vsel %vm525_vm10, %v1958_v56, %v1920_v42  ;;  %v1252_v42 = vsel %vm523_vm9, %v1251_v7, %v1231_v22  ;;  %v4583_v22 = vld [vmem:[#allocation42_spill] sm:$0xff]  ;;  %v4593_v7 = vld [vmem:[#allocation52_spill] sm:$0xff] }
 0x22e   : > { %v4235_v53 = vpop.permute.xlu0 %1468  ;;  %v4237_v40 = vpop.permute.xlu1 %460 }
 0x22f   : > { %v1490_v55 = vsel %vm523_vm9, %v4165_v18, %v4235_v53 }
 0x232   : > { %v1709_v4 = vpop.permute.xlu0 %1708  ;;  %v4243_v17 = vpop.permute.xlu1 %715 }
 0x233   : > { %v1724_v6 = vsel %vm527_vm11, %v1723_v32, %v1709_v4  ;;  %v4581_v4 = vld [vmem:[#allocation46_spill] sm:$0xff] }
 0x234   : > { %v1728_v15 = vrot.slane %v1724_v6, 4  ;;  %v4582_v6 = vld [vmem:[#allocation16_spill] sm:$0xff] }
 0x235   : > { %v1241_v44 = vsel %vm515_vm5, %v4582_v6, %v4581_v4 }
 0x236   : > { %1732 = vst [vmem:[#allocation3 + $0x28] sm:$0xf0] %v1728_v15  ;;  %v1952_v28 = vpop.permute.xlu0 %1951  ;;  %v4252_v33 = vpop.permute.xlu1 %953 }
 0x237   : > { %v1967_v30 = vsel %vm527_vm11, %v1966_v41, %v1952_v28 }
 0x238   : > { %1969 = vst [vmem:[#allocation3 + $0x20] sm:$0xf] %v1967_v30  ;;  %v1242_v30 = vsel %vm517_vm6, %v1241_v44, %v4583_v22  ;;  %v4594_v44 = vld [vmem:[#allocation50_spill] sm:$0xff] }
 0x23a   : > { %v4255_v39 = vpop.permute.xlu0 %492  ;;  %v1203_v32 = vpop.permute.xlu1 %1202 }
 0x23e   : > { %v4257_v19 = vpop.permute.xlu0 %747  ;;  %v4259_v63 = vpop.permute.xlu1 %1440 }
 0x23f   : > { %v2448_v23 = vld [vmem:[#allocation3 + $0x20] sm:$0xff] }
 0x240   : > { %2486 = vmatprep.subr.mxu0 %v2448_v23 }
 0x242   : > { %v4263_v12 = vpop.permute.xlu0 %985  ;;  %v1681_v52 = vpop.permute.xlu1 %1680 }
 0x243   : > { %v1717_v13 = vsel %vm527_vm11, %v1716_v48, %v1681_v52  ;;  %v4584_v48 = vld [vmem:[#allocation47_spill] sm:$0xff] }
 0x244   : > { %v1727_v0 = vrot.slane %v1717_v13, 4  ;;  %v1243_v52 = vsel %vm519_vm7, %v1242_v30, %v4584_v48 }
 0x245   : > { %v1244_v13 = vsel %vm521_vm8, %v1243_v52, %v4222_v50  ;;  %v1483_v50 = vsel %vm523_vm9, %v4228_v27, %v4259_v63  ;;  %v4590_v27 = vld [vmem:[#allocation56_spill] sm:$0xff] }
 0x246   : > { %v1235_v35 = vpop.permute.xlu0 %1234  ;;  %1731 = vst [vmem:[#allocation3 + $0x48] sm:$0xf0] %v1727_v0  ;;  %v4270_v29 = vpop.permute.xlu1 %464  ;;  %v1245_v18 = vsel %vm523_vm9, %v1244_v13, %v1203_v32  ;;  %v4591_v63 = vld [vmem:[#allocation40_spill] sm:$0xff] }
 0x247   : > { %v1253_v25 = vsel %vm525_vm10, %v1252_v42, %v1235_v35  ;;  %v4595_v13 = vld [vmem:[#allocation8_spill] sm:$0xff] }
 0x24a   : > { %v1473_v24 = vpop.permute.xlu0 %1472  ;;  %v4276_v10 = vpop.permute.xlu1 %719 }
 0x24b   : > { %v1491_v41 = vsel %vm525_vm10, %v1490_v55, %v1473_v24 }
 0x24e   : > { %v1924_v3 = vpop.permute.xlu0 %1923  ;;  %v4283_v16 = vpop.permute.xlu1 %957 }
 0x24f   : > { %v1960_v57 = vsel %vm527_vm11, %v1959_v34, %v1924_v3  ;;  %v4585_v34 = vld [vmem:[#allocation54_spill] sm:$0xff]  ;;  %v4586_v3 = vld [vmem:[#allocation28_spill] sm:$0xff] }
 0x250   : > { %1968 = vst [vmem:[#allocation3 + $0x8] sm:$0xf] %v1960_v57  ;;  %v769_v57 = vsel %vm515_vm5, %v4586_v3, %v4585_v34 }
 0x251   : > { %v770_v21 = vsel %vm517_vm6, %v769_v57, %v4589_v20  ;;  %v4599_v57 = vld [vmem:[#allocation51_spill] sm:$0xff] }
 0x252   : > { %v4286_v43 = vpop.permute.xlu0 %496  ;;  %v1207_v37 = vpop.permute.xlu1 %1206  ;;  %v771_v38 = vsel %vm519_vm7, %v770_v21, %v4592_v45  ;;  %v2440_v45 = vld [vmem:[%s4427_s1] sm:$0xff] }
 0x253   : > { %v1246_v31 = vsel %vm525_vm10, %v1245_v18, %v1207_v37 }
 0x256   : > { %v752_v9 = vpop.permute.xlu0 %751  ;;  %v1445_v36 = vpop.permute.xlu1 %1444 }
 0x257   : > { %v2447_v11 = vld [vmem:[#allocation3 + $0x8] sm:$0xff]  ;;  %v1484_v32 = vsel %vm525_vm10, %v1483_v50, %v1445_v36  ;;  %v1007_v36 = vsel %vm515_vm5, %v4591_v63, %v4590_v27 }
 0x258   : > { %2487 = vmatpush1.msra.mxu0 %v2447_v11  ;;  %v762_v11 = vsel %vm515_vm5, %v4588_v1, %v4587_v58 }
 0x259   : > { %v763_v42 = vsel %vm517_vm6, %v762_v11, %v4593_v7 }
 0x25a   : > { %v4295_v51 = vpop.permute.xlu0 %989  ;;  %v4297_v5 = vpop.permute.xlu1 %468 }
 0x25e   : > { %v1239_v62 = vpop.permute.xlu0 %1238  ;;  %v724_v59 = vpop.permute.xlu1 %723 }
 0x25f   : > { %v1254_v47 = vsel %vm527_vm11, %v1253_v25, %v1239_v62  ;;  %v764_v62 = vsel %vm519_vm7, %v763_v42, %v4243_v17 }
 0x260   : > { %v1258_v15 = vrot.slane %v1254_v47, 4  ;;  %v772_v47 = vsel %vm521_vm8, %v771_v38, %v4257_v19  ;;  %v765_v4 = vsel %vm521_vm8, %v764_v62, %v4276_v10 }
 0x261   : > { %v773_v6 = vsel %vm523_vm9, %v772_v47, %v752_v9  ;;  %v766_v55 = vsel %vm523_vm9, %v765_v4, %v724_v59 }
 0x262   : > { %1262 = vst [vmem:[#allocation3 + $0x10] sm:$0xf0] %v1258_v15  ;;  %v1477_v28 = vpop.permute.xlu0 %1476  ;;  %v4313_v23 = vpop.permute.xlu1 %961  ;;  %v1008_v15 = vsel %vm517_vm6, %v1007_v36, %v4594_v44 }
 0x263   : > { %v1492_v61 = vsel %vm527_vm11, %v1491_v41, %v1477_v28  ;;  %v1009_v22 = vsel %vm519_vm7, %v1008_v15, %v4230_v46  ;;  %v516_v46 = vsel %vm515_vm5, %v4595_v13, %v4237_v40 }
 0x264   : > { %1494 = vst [vmem:[#allocation3 + $0x28] sm:$0xf] %v1492_v61  ;;  %v1010_v10 = vsel %vm521_vm8, %v1009_v22, %v4263_v12 }
 0x265   : > { %v1011_v59 = vsel %vm523_vm9, %v1010_v10, %v4295_v51 }
 0x266   : > { %v4321_v53 = vpop.permute.xlu0 %500  ;;  %v1211_v8 = vpop.permute.xlu1 %1210 }
 0x267   : > { %v1247_v0 = vsel %vm527_vm11, %v1246_v31, %v1211_v8  ;;  %v4596_v8 = vld [vmem:[#allocation57_spill] sm:$0xff] }
 0x268   : > { %v1257_v35 = vrot.slane %v1247_v0, 4  ;;  %v4597_v0 = vld [vmem:[#allocation38_spill] sm:$0xff] }
 0x269   : > { %v1000_v12 = vsel %vm515_vm5, %v4597_v0, %v4596_v8 }
 0x26a   : > { %v756_v26 = vpop.permute.xlu0 %755  ;;  %1261 = vst [vmem:[#allocation3 + $0x18] sm:$0xf0] %v1257_v35  ;;  %v473_v14 = vpop.permute.xlu1 %472  ;;  %v518_v35 = vsel %vm517_vm6, %v516_v46, %v4270_v29 }
 0x26b   : > { %v2446_v24 = vld [vmem:[#allocation3 + $0x28] sm:$0xff]  ;;  %v774_v41 = vsel %vm525_vm10, %v773_v6, %v756_v26 }
 0x26c   : > { %2488 = vmatprep.subr.mxu0 %v2446_v24  ;;  %v520_v24 = vsel %vm519_vm7, %v518_v35, %v4297_v5 }
 0x26d   : > { %v522_v40 = vsel %vm521_vm8, %v520_v24, %v473_v14 }
 0x26e   : > { %v994_v49 = vpop.permute.xlu0 %993  ;;  %v728_v54 = vpop.permute.xlu1 %727 }
 0x26f   : > { %v767_v17 = vsel %vm525_vm10, %v766_v55, %v728_v54  ;;  %v1012_v18 = vsel %vm525_vm10, %v1011_v59, %v994_v49  ;;  %v4598_v49 = vld [vmem:[#allocation53_spill] sm:$0xff] }
 0x270   : > { %v1001_v54 = vsel %vm517_vm6, %v1000_v12, %v4598_v49 }
 0x272   : > { %v1449_v56 = vpop.permute.xlu0 %1448  ;;  %v966_v37 = vpop.permute.xlu1 %965 }
 0x273   : > { %v1485_v60 = vsel %vm527_vm11, %v1484_v32, %v1449_v56  ;;  %v1002_v56 = vsel %vm519_vm7, %v1001_v54, %v4252_v33 }
 0x274   : > { %1493 = vst [vmem:[#allocation3 + $0x48] sm:$0xf] %v1485_v60  ;;  %v1003_v3 = vsel %vm521_vm8, %v1002_v56, %v4283_v16  ;;  %v4600_v60 = vld [vmem:[#allocation24_spill] sm:$0xff] }
 0x275   : > { %v529_v14 = vsel %vm515_vm5, %v4600_v60, %v4599_v57  ;;  %v1004_v58 = vsel %vm523_vm9, %v1003_v3, %v4313_v23 }
 0x276   : > { %v505_v2 = vpop.permute.xlu0 %504  ;;  %v477_v25 = vpop.permute.xlu1 %476  ;;  %v530_v1 = vsel %vm517_vm6, %v529_v14, %v4255_v39  ;;  %v1005_v33 = vsel %vm525_vm10, %v1004_v58, %v966_v37 }
 0x277   : > { %v524_v50 = vsel %vm523_vm9, %v522_v40, %v477_v25  ;;  %v531_v20 = vsel %vm519_vm7, %v530_v1, %v4286_v43 }
 0x278   : > { %v532_v27 = vsel %vm521_vm8, %v531_v20, %v4321_v53 }
 0x279   : > { %v533_v23 = vsel %vm523_vm9, %v532_v27, %v505_v2 }
 0x27a   : > { %v760_v28 = vpop.permute.xlu0 %759  ;;  %v732_v30 = vpop.permute.xlu1 %731 }
 0x27b   : > { %v775_v19 = vsel %vm527_vm11, %v774_v41, %v760_v28  ;;  %v2445_v61 = vld [vmem:[#allocation3 + $0x48] sm:$0xff]  ;;  %v768_v9 = vsel %vm527_vm11, %v767_v17, %v732_v30 }
 0x27c   : > { %v779_v48 = vrot.slane %v775_v19, 4  ;;  %2489 = vmatpush1.msra.mxu0 %v2445_v61  ;;  %v778_v52 = vrot.slane %v768_v9, 4 }
 0x27e   : > { %783 = vst [vmem:[#allocation3] sm:$0xf0] %v779_v48  ;;  %v998_v31 = vpop.permute.xlu0 %997  ;;  %782 = vst [vmem:[#allocation3 + $0x30] sm:$0xf0] %v778_v52  ;;  %v481_v26 = vpop.permute.xlu1 %480 }
 0x27f   : > { %v1013_v51 = vsel %vm527_vm11, %v1012_v18, %v998_v31  ;;  %v526_v29 = vsel %vm525_vm10, %v524_v50, %v481_v26 }
 0x280   : > { %1015 = vst [vmem:[#allocation3 + $0x10] sm:$0xf] %v1013_v51 }
 0x282   : > { %v509_v32 = vpop.permute.xlu0 %508  ;;  %v485_v34 = vpop.permute.xlu1 %484 }
 0x283   : > { %v528_v5 = vsel %vm527_vm11, %v526_v29, %v485_v34  ;;  %v534_v63 = vsel %vm525_vm10, %v533_v23, %v509_v32 }
 0x284   : > { %536 = vst [vmem:[#allocation3 + $0x30] sm:$0xf] %v528_v5 }
 0x286   : > { %v970_v11 = vpop.permute.xlu0 %969 }
 0x287   : > { %v1006_v16 = vsel %vm527_vm11, %v1005_v33, %v970_v11  ;;  %v2444_v21 = vld [vmem:[#allocation3 + $0x10] sm:$0xff] }
 0x288   : > { %1014 = vst [vmem:[#allocation3 + $0x18] sm:$0xf] %v1006_v16  ;;  %2490 = vmatprep.subr.mxu0 %v2444_v21 }
 0x28a   : > { %v513_v39 = vpop.permute.xlu0 %512 }
 0x28b   : > { %v535_v37 = vsel %vm527_vm11, %v534_v63, %v513_v39  ;;  %v2441_v53 = vld [vmem:[#allocation3 + $0x30] sm:$0xff] }
 0x28c   : > { %537 = vst [vmem:[#allocation3] sm:$0xf] %v535_v37 }
 0x28f   : > { %v2443_v36 = vld [vmem:[#allocation3 + $0x18] sm:$0xff] }
 0x290   : > { %2491 = vmatpush1.msra.mxu0 %v2443_v36 }
 0x293   : > { %v2442_v43 = vld [vmem:[#allocation3] sm:$0xff] }
 0x294   : > { %2492 = vmatprep.subr.mxu0 %v2442_v43 }
 0x295   : > { %2493 = vmatpush1.msra.mxu0 %v2441_v53 }
 0x296   : > { %2737 = vmatmul.mubr.msk.f32.vlgmr.msra.gmra.mxu0 %vm2451_vm13, %v2440_v45 }
 0x356   : > { %v2528_v2 = vpop.f32.mrf.mxu0 }
 0x357   : > { %2533 = vst [vmem:[%s232_s12] sm:$0xff] %v2528_v2 }
 0x358   : > { %v2530_v38 = vpop.f32.mrf.mxu0 }
 0x359   : > { %2534 = vst [vmem:[%s232_s12 + $0x8] sm:$0xff] %v2530_v38  ;;  %v2535_v7 = vadd.f32 %v2530_v38, %v2528_v2 }
 0x35b   : > { %2536 = vadd.xlane.f32.xlu0 %v2535_v7 }
 0x3e4   : > { %v2537_v42 = vpop.xlane.xlu0 %2536 }
 0x3e5   : > { %v2538_v25 = vmul.f32 0.00390625, %v2537_v42  ;;  %2550 = vst.msk [vmem:[%s237_s20] sm:$0xff] %vm2549_vm14, %v2537_v42 }
 0x3e7   : > { %v2539_v62 = vsub.f32 %v2528_v2, %v2538_v25  ;;  %v2540_v47 = vsub.f32 %v2530_v38, %v2538_v25 }
 0x3e9   : > { %v2541_v4 = vmul.f32 %v2539_v62, %v2539_v62  ;;  %v2542_v6 = vmul.f32 %v2540_v47, %v2540_v47 }
 0x3eb   : > { %v2543_v44 = vadd.f32 %v2542_v6, %v2541_v4 }
 0x3ed   : > { %2544 = vadd.xlane.f32.xlu1 %v2543_v44 }
 0x476   : > { %v2545_v15 = vpop.xlane.xlu1 %2544 }
 0x477   : > { %2551 = vst.msk [vmem:[%s241_s23] sm:$0xff] %vm2549_vm14, %v2545_v15 }
 0x478 PF: > { %s15_s17 = sadd.s32 1, %s2809_s17   ;;  %s4601_s15 = smov %s2805_s16 }
 0x479   : > { %p12_p5 = scmp.ge.s32.totalorder %s15_s17, 4   ;;  %s4602_s16 = smov %s4604_s18 }
 0x47b   :  { %14 = sbr.rel (!%p12_p5) target bundleno = 2 (0x2), region = 95 }

</bundles_post_ra>
